<compile_context>
chip_gen: v5e
topology: v5e:2x2
jax: 0.10.0
libtpu: 0.0.40
codegen_flags: <defaults>
</compile_context>

<pallas_src>
import jax
import jax.numpy as jnp
from jax.experimental import pallas as pl
from jax.experimental.pallas import tpu as pltpu


def _round_up(x, m):
    return ((x + m - 1) // m) * m


def _fused_matmul_bn_mish_kernel(a_ref, b_ref, scale_ref, bias_ref, o_ref, acc_ref):
    k = pl.program_id(2)

    @pl.when(k == 0)
    def _init():
        acc_ref[...] = jnp.zeros_like(acc_ref)

    acc_ref[...] += jnp.dot(a_ref[...], b_ref[...],
                            preferred_element_type=jnp.float32)

    @pl.when(k == pl.num_programs(2) - 1)
    def _finalize():
        # Folded (eval-mode) BatchNorm: y = conv * scale + bias.
        y = acc_ref[...] * scale_ref[...] + bias_ref[...]
        # Mish(y) = y * tanh(softplus(y)), single-exp formulation:
        #   tanh(softplus(y)) = ((1 + e^y)^2 - 1) / ((1 + e^y)^2 + 1)
        # expressed via u = exp(-|y|) (never overflows):
        #   y >= 0:  (2u + 1)   / (2u(u + 1) + 1)
        #   y <  0:  u(u + 2)   / (u(u + 2) + 2)
        u = jnp.exp(-jnp.abs(y))
        pos = y >= 0.0
        num = jnp.where(pos, 2.0 * u + 1.0, u * (u + 2.0))
        den = jnp.where(pos, 2.0 * u * (u + 1.0) + 1.0, u * (u + 2.0) + 2.0)
        r = pl.reciprocal(den, approx=True)
        r = r * (2.0 - den * r)          # one Newton step -> ~f32 accuracy
        o_ref[...] = (y * num * r).astype(o_ref.dtype)


def _fused_gemm_bn_mish(a, b, scale, bias, out_dtype,
                        tile_m=256, tile_n=256, tile_k=256):
    """mish((a @ b) * scale + bias) with the BN/Mish epilogue fused into the
    finalize step of a tiled MXU matmul."""
    M, K = a.shape
    K2, N = b.shape
    assert K == K2

    tm = min(tile_m, _round_up(M, 8))
    tk = min(tile_k, _round_up(K, 128))
    tn = min(tile_n, _round_up(N, 128))
    Mp, Kp, Np = _round_up(M, tm), _round_up(K, tk), _round_up(N, tn)

    a_p = jnp.pad(a, ((0, Mp - M), (0, Kp - K)))
    b_p = jnp.pad(b, ((0, Kp - K), (0, Np - N)))
    scale_p = jnp.pad(scale.astype(jnp.float32).reshape(1, N), ((0, 0), (0, Np - N)))
    bias_p = jnp.pad(bias.astype(jnp.float32).reshape(1, N), ((0, 0), (0, Np - N)))

    grid = (Mp // tm, Np // tn, Kp // tk)

    cost = pl.CostEstimate(
        flops=2 * Mp * Np * Kp,
        transcendentals=2 * Mp * Np,          # one exp + one reciprocal / element
        bytes_accessed=4 * (Mp * Kp + Kp * Np + 2 * Mp * Np),
    )

    out_p = pl.pallas_call(
        _fused_matmul_bn_mish_kernel,
        out_shape=jax.ShapeDtypeStruct((Mp, Np), out_dtype),
        grid_spec=pltpu.PrefetchScalarGridSpec(
            num_scalar_prefetch=0,
            grid=grid,
            in_specs=[
                pl.BlockSpec((tm, tk), lambda i, j, k: (i, k)),
                pl.BlockSpec((tk, tn), lambda i, j, k: (k, j)),
                pl.BlockSpec((1, tn), lambda i, j, k: (0, j)),
                pl.BlockSpec((1, tn), lambda i, j, k: (0, j)),
            ],
            out_specs=pl.BlockSpec((tm, tn), lambda i, j, k: (i, j)),
            scratch_shapes=[pltpu.VMEM((tm, tn), jnp.float32)],
        ),
        compiler_params=pltpu.CompilerParams(
            dimension_semantics=("parallel", "parallel", "arbitrary")),
        cost_estimate=cost,
    )(a_p, b_p, scale_p, bias_p)

    return out_p[:M, :N]


def _im2col_nhwc(x, kh, kw, stride, padding, dilation):
    """x: (N, H, W, C) -> patches (N*HO*WO, KH*KW*C); K ordered (kh, kw, c)."""
    n, h, w, c = x.shape
    ho = (h + 2 * padding - dilation * (kh - 1) - 1) // stride + 1
    wo = (w + 2 * padding - dilation * (kw - 1) - 1) // stride + 1
    xp = jnp.pad(x, ((0, 0), (padding, padding), (padding, padding), (0, 0)))
    cols = []
    for i in range(kh):
        for j in range(kw):
            h0 = i * dilation
            w0 = j * dilation
            cols.append(xp[:, h0:h0 + (ho - 1) * stride + 1:stride,
                           w0:w0 + (wo - 1) * stride + 1:stride, :])
    patches = jnp.stack(cols, axis=3)            # (N, HO, WO, KH*KW, C)
    return patches.reshape(n * ho * wo, kh * kw * c), ho, wo


def bn_conv_mish_forward(x_nchw, weight_oihw, gamma, beta, running_mean,
                         running_var, *, stride=1, padding=0, dilation=1,
                         groups=1, conv_bias=None, eps=1e-5):
    """Forward of PyTorch BN_Conv_Mish: Mish(BatchNorm2d(Conv2d(x)))."""
    if groups != 1:
        # TODO(synk): groups > 1 would need per-group GEMMs; not implemented.
        raise NotImplementedError("groups != 1 is not supported")
    # TODO(synk): training-mode BatchNorm (batch statistics) would need a second
    # reduction pass over the conv output; eval-mode running stats are fused here.

    c_out, c_in, kh, kw = weight_oihw.shape
    x = jnp.transpose(x_nchw, (0, 2, 3, 1))      # NCHW -> NHWC (channels on lanes)
    n = x.shape[0]

    a, ho, wo = _im2col_nhwc(x, kh, kw, stride, padding, dilation)
    b = jnp.transpose(weight_oihw, (2, 3, 1, 0)).reshape(kh * kw * c_in, c_out)

    scale = gamma / jnp.sqrt(running_var + eps)  # fold BN into scale/bias
    bias = beta - running_mean * scale
    if conv_bias is not None:
        bias = bias + conv_bias * scale

    out2d = _fused_gemm_bn_mish(a, b, scale, bias, out_dtype=x_nchw.dtype)
    out = out2d.reshape(n, ho, wo, c_out)
    return jnp.transpose(out, (0, 3, 1, 2))      # back to NCHW (PyTorch layout)


def _reference(x, weight, gamma, beta, mean, var, *, stride, padding, dilation,
               eps=1e-5):
    conv = jax.lax.conv_general_dilated(
        x, weight, window_strides=(stride, stride),
        padding=[(padding, padding), (padding, padding)],
        rhs_dilation=(dilation, dilation),
        dimension_numbers=("NCHW", "OIHW", "NCHW"))
    s = (gamma / jnp.sqrt(var + eps))[None, :, None, None]
    t = (beta - mean * gamma / jnp.sqrt(var + eps))[None, :, None, None]
    y = conv * s + t
    return y * jnp.tanh(jax.nn.softplus(y))


if __name__ == "__main__":
    key = jax.random.PRNGKey(0)
    k_x, k_w, k_g, k_b, k_m, k_v = jax.random.split(key, 6)

    # BN_Conv_Mish(in_channels=4, out_channels=8, kernel_size=3, stride=1, padding=1)
    N, C_in, H, W = 2, 4, 16, 16
    C_out, KH, KW = 8, 3, 3
    stride, padding, dilation = 1, 1, 1

    x = jax.random.normal(k_x, (N, C_in, H, W), dtype=jnp.float32)
    weight = jax.random.normal(k_w, (C_out, C_in, KH, KW), dtype=jnp.float32) * 0.2
    gamma = jax.random.uniform(k_g, (C_out,), jnp.float32, minval=0.5, maxval=1.5)
    beta = jax.random.normal(k_b, (C_out,), dtype=jnp.float32) * 0.1
    running_mean = jax.random.normal(k_m, (C_out,), dtype=jnp.float32) * 0.1
    running_var = jax.random.uniform(k_v, (C_out,), jnp.float32, minval=0.5, maxval=1.5)

    y = bn_conv_mish_forward(x, weight, gamma, beta, running_mean, running_var,
                             stride=stride, padding=padding, dilation=dilation)
    jax.block_until_ready(y)

    ref = _reference(x, weight, gamma, beta, running_mean, running_var,
                     stride=stride, padding=padding, dilation=dilation)

    assert y.shape == (N, C_out, H, W) and y.dtype == x.dtype
    assert jnp.allclose(y, ref, atol=1e-2, rtol=1e-2), \
        float(jnp.max(jnp.abs(y - ref)))

    print("KERNEL_OK")
</pallas_src>

<mosaic_0001>
module attributes {stable_mosaic.version = 11 : i64} {
  func.func @_fused_matmul_bn_mish_kernel(%arg0: i32, %arg1: i32, %arg2: i32, %arg3: memref<256x128xf32, #tpu.memory_space<vmem>>, %arg4: memref<128x128xf32, #tpu.memory_space<vmem>>, %arg5: memref<1x128xf32, #tpu.memory_space<vmem>>, %arg6: memref<1x128xf32, #tpu.memory_space<vmem>>, %arg7: memref<256x128xf32, #tpu.memory_space<vmem>>, %arg8: memref<256x128xf32, #tpu.memory_space<vmem>>) attributes {dimension_semantics = [#tpu.dimension_semantics<parallel>, #tpu.dimension_semantics<parallel>, #tpu.dimension_semantics<arbitrary>], iteration_bounds = array<i64: 2, 1, 1>, scalar_prefetch = 0 : i64, scratch_operands = 1 : i64, tpu.core_type = #tpu.core_type<tc>, window_params = [{transform_indices = @transform_0, window_bounds = array<i64: 256, 128>}, {transform_indices = @transform_1, window_bounds = array<i64: 128, 128>}, {transform_indices = @transform_2, window_bounds = array<i64: 1, 128>}, {transform_indices = @transform_3, window_bounds = array<i64: 1, 128>}, {transform_indices = @transform_4, window_bounds = array<i64: 256, 128>}]} {
    %c0_i32 = arith.constant 0 : i32
    %0 = arith.cmpi eq, %arg2, %c0_i32 : i32
    %1 = arith.extui %0 : i1 to i32
    %c0_i32_0 = arith.constant 0 : i32
    %2 = arith.cmpi ne, %1, %c0_i32_0 : i32
    scf.if %2 {
      %cst_10 = arith.constant 0.000000e+00 : f32
      %12 = vector.broadcast %cst_10 : f32 to vector<256x128xf32>
      %c0_11 = arith.constant 0 : index
      %c0_12 = arith.constant 0 : index
      %13 = vector.load %arg8[%c0_11, %c0_12] : memref<256x128xf32, #tpu.memory_space<vmem>>, vector<256x128xf32>
      tpu.vector_store %arg8[%c0_11, %c0_12], %12 {strides = array<i32>} : memref<256x128xf32, #tpu.memory_space<vmem>>, vector<256x128xf32>,
    } else {
    }
    %c0 = arith.constant 0 : index
    %c0_1 = arith.constant 0 : index
    %3 = vector.load %arg8[%c0, %c0_1] : memref<256x128xf32, #tpu.memory_space<vmem>>, vector<256x128xf32>
    %c0_2 = arith.constant 0 : index
    %c0_3 = arith.constant 0 : index
    %4 = vector.load %arg3[%c0_2, %c0_3] : memref<256x128xf32, #tpu.memory_space<vmem>>, vector<256x128xf32>
    %c0_4 = arith.constant 0 : index
    %c0_5 = arith.constant 0 : index
    %5 = vector.load %arg4[%c0_4, %c0_5] : memref<128x128xf32, #tpu.memory_space<vmem>>, vector<128x128xf32>
    %cst = arith.constant dense<0.000000e+00> : vector<256x128xf32>
    %6 = tpu.matmul %4, %5, %cst {dimension_numbers = #tpu.dot_dimension_numbers<[1], [0], [0], [1], [0, 0, 1, 1], [], []>} : vector<256x128xf32>, vector<128x128xf32>, vector<256x128xf32> -> vector<256x128xf32>
    %7 = arith.addf %3, %6 : vector<256x128xf32>
    %c0_6 = arith.constant 0 : index
    %c0_7 = arith.constant 0 : index
    %8 = vector.load %arg8[%c0_6, %c0_7] : memref<256x128xf32, #tpu.memory_space<vmem>>, vector<256x128xf32>
    tpu.vector_store %arg8[%c0_6, %c0_7], %7 {strides = array<i32>} : memref<256x128xf32, #tpu.memory_space<vmem>>, vector<256x128xf32>,
    %c0_i32_8 = arith.constant 0 : i32
    %9 = arith.cmpi eq, %arg2, %c0_i32_8 : i32
    %10 = arith.extui %9 : i1 to i32
    %c0_i32_9 = arith.constant 0 : i32
    %11 = arith.cmpi ne, %10, %c0_i32_9 : i32
    scf.if %11 {
      %c0_10 = arith.constant 0 : index
      %c0_11 = arith.constant 0 : index
      %12 = vector.load %arg8[%c0_10, %c0_11] : memref<256x128xf32, #tpu.memory_space<vmem>>, vector<256x128xf32>
      %c0_12 = arith.constant 0 : index
      %c0_13 = arith.constant 0 : index
      %13 = vector.load %arg5[%c0_12, %c0_13] : memref<1x128xf32, #tpu.memory_space<vmem>>, vector<1x128xf32>
      %14 = vector.broadcast %13 : vector<1x128xf32> to vector<256x128xf32>
      %15 = arith.mulf %12, %14 : vector<256x128xf32>
      %c0_14 = arith.constant 0 : index
      %c0_15 = arith.constant 0 : index
      %16 = vector.load %arg6[%c0_14, %c0_15] : memref<1x128xf32, #tpu.memory_space<vmem>>, vector<1x128xf32>
      %17 = vector.broadcast %16 : vector<1x128xf32> to vector<256x128xf32>
      %18 = arith.addf %15, %17 : vector<256x128xf32>
      %19 = math.absf %18 : vector<256x128xf32>
      %cst_16 = arith.constant 0.000000e+00 : f32
      %20 = vector.broadcast %cst_16 : f32 to vector<256x128xf32>
      %21 = arith.subf %20, %19 : vector<256x128xf32>
      %22 = math.exp %21 : vector<256x128xf32>
      %cst_17 = arith.constant 0.000000e+00 : f32
      %23 = vector.broadcast %cst_17 : f32 to vector<256x128xf32>
      %24 = arith.cmpf oge, %18, %23 : vector<256x128xf32>
      %cst_18 = arith.constant 2.000000e+00 : f32
      %25 = vector.broadcast %cst_18 : f32 to vector<256x128xf32>
      %26 = arith.mulf %25, %22 : vector<256x128xf32>
      %cst_19 = arith.constant 1.000000e+00 : f32
      %27 = vector.broadcast %cst_19 : f32 to vector<256x128xf32>
      %28 = arith.addf %26, %27 : vector<256x128xf32>
      %cst_20 = arith.constant 2.000000e+00 : f32
      %29 = vector.broadcast %cst_20 : f32 to vector<256x128xf32>
      %30 = arith.addf %22, %29 : vector<256x128xf32>
      %31 = arith.mulf %22, %30 : vector<256x128xf32>
      %32 = arith.select %24, %28, %31 : vector<256x128xi1>, vector<256x128xf32>
      %cst_21 = arith.constant 2.000000e+00 : f32
      %33 = vector.broadcast %cst_21 : f32 to vector<256x128xf32>
      %34 = arith.mulf %33, %22 : vector<256x128xf32>
      %cst_22 = arith.constant 1.000000e+00 : f32
      %35 = vector.broadcast %cst_22 : f32 to vector<256x128xf32>
      %36 = arith.addf %22, %35 : vector<256x128xf32>
      %37 = arith.mulf %34, %36 : vector<256x128xf32>
      %cst_23 = arith.constant 1.000000e+00 : f32
      %38 = vector.broadcast %cst_23 : f32 to vector<256x128xf32>
      %39 = arith.addf %37, %38 : vector<256x128xf32>
      %cst_24 = arith.constant 2.000000e+00 : f32
      %40 = vector.broadcast %cst_24 : f32 to vector<256x128xf32>
      %41 = arith.addf %22, %40 : vector<256x128xf32>
      %42 = arith.mulf %22, %41 : vector<256x128xf32>
      %cst_25 = arith.constant 2.000000e+00 : f32
      %43 = vector.broadcast %cst_25 : f32 to vector<256x128xf32>
      %44 = arith.addf %42, %43 : vector<256x128xf32>
      %45 = arith.select %24, %39, %44 : vector<256x128xi1>, vector<256x128xf32>
      %46 = tpu.reciprocal %45 {approx = true} : vector<256x128xf32> -> vector<256x128xf32>
      %47 = arith.mulf %45, %46 : vector<256x128xf32>
      %cst_26 = arith.constant 2.000000e+00 : f32
      %48 = vector.broadcast %cst_26 : f32 to vector<256x128xf32>
      %49 = arith.subf %48, %47 : vector<256x128xf32>
      %50 = arith.mulf %46, %49 : vector<256x128xf32>
      %51 = arith.mulf %18, %32 : vector<256x128xf32>
      %52 = arith.mulf %51, %50 : vector<256x128xf32>
      %c0_27 = arith.constant 0 : index
      %c0_28 = arith.constant 0 : index
      %53 = vector.load %arg7[%c0_27, %c0_28] : memref<256x128xf32, #tpu.memory_space<vmem>>, vector<256x128xf32>
      tpu.vector_store %arg7[%c0_27, %c0_28], %52 {strides = array<i32>} : memref<256x128xf32, #tpu.memory_space<vmem>>, vector<256x128xf32>,
    } else {
    }
    return
  }
  func.func @transform_0(%arg0: i32, %arg1: i32, %arg2: i32) -> (i32, i32) {
    %c0_i32 = arith.constant 0 : i32
    return %arg0, %arg2 : i32, i32
  }
  func.func @transform_1(%arg0: i32, %arg1: i32, %arg2: i32) -> (i32, i32) {
    %c0_i32 = arith.constant 0 : i32
    return %arg2, %arg1 : i32, i32
  }
  func.func @transform_2(%arg0: i32, %arg1: i32, %arg2: i32) -> (i32, i32) {
    %c0_i32 = arith.constant 0 : i32
    %c0_i32_0 = arith.constant 0 : i32
    return %c0_i32, %arg1 : i32, i32
  }
  func.func @transform_3(%arg0: i32, %arg1: i32, %arg2: i32) -> (i32, i32) {
    %c0_i32 = arith.constant 0 : i32
    %c0_i32_0 = arith.constant 0 : i32
    return %c0_i32, %arg1 : i32, i32
  }
  func.func @transform_4(%arg0: i32, %arg1: i32, %arg2: i32) -> (i32, i32) {
    %c0_i32 = arith.constant 0 : i32
    return %arg0, %arg1 : i32, i32
  }
}

</mosaic_0001>

<bundles_post_ra>
// kernel: tpu_custom_call.1
= control target key start
LH: loop header
LB: loop body
LE: loop exit
PB: predicated region body
PF: predicated region fallthrough
CT: control target
= control target key end

     0   :  { %s2606_s0 = inlined_call_operand.hbm [shape: f32[512,128], index: 0, kind: input, shape index: {}]   ;;  %s2607_s1 = inlined_call_operand.hbm [shape: f32[128,128], index: 1, kind: input, shape index: {}]   ;;  %s2608_s2 = inlined_call_operand.vmem [shape: f32[1,128], index: 2, kind: input, shape index: {}]   ;;  %s2609_s3 = inlined_call_operand.vmem [shape: f32[1,128], index: 3, kind: input, shape index: {}]   ;;  %s2610_s4 = inlined_call_operand.hbm [shape: f32[512,128], index: 4, kind: output, shape index: {}]  }
   0x1   :  { %2614 = sst [smem:[#allocation13_spill]] %s2607_s1 }
   0x2   :  { %9 = vsyncpa [#allocation4], 0 }
   0x3   :  { %11 = vsyncpa [#allocation4 + $0x1], 0 }
   0x4   :  { %12 = vsyncpa [#allocation7], 0 }
   0x5   :  { %13 = vsyncpa [#allocation5], 0 }
   0x6   :  { %15 = vsyncpa [#allocation5 + $0x1], 0  ;;  %s2004_s15 = smov 0   ;;  %s2006_s16 = smov 0  }
   0x7   :  { %s2008_s17 = smov 0   ;;  %s2010_s18 = smov 0  }
   0x8   :  { %s2012_s19 = smov 0   ;;  %s2014_s20 = smov 0  }
   0x9 LB: > { %s1548_s21 = sadd.s32 4294967295, %s1972_s20   ;;  %s1549_s22 = sadd.s32 4294967294, %s1972_s20   ;;  %s1972_s20 = sphi %s2014_s20, %s21_s20   ;;  %s1968_s19 = sphi %s2012_s19, %s2631_s19   ;;  %s1964_s18 = sphi %s2010_s18, %s2630_s18   ;;  %s1960_s17 = sphi %s2008_s17, %s2629_s17   ;;  %s1956_s16 = sphi %s2006_s16, %s2628_s16   ;;  %s1952_s15 = sphi %s2004_s15, %s2627_s15  }
   0xa   : > { %p62_p0 = scmp.ne.s32.totalorder %s1956_s16, %s1952_s15  ;;  %p2038_p1 = scmp.eq.s32.totalorder %s1548_s21, 0 }
   0xb   : > { %p2042_p2 = scmp.eq.s32.totalorder %s1548_s21, 1  ;;  %p174_p3 = scmp.eq.s32.totalorder %s1549_s22, 1 }
   0xc   : > { %p2048_p4 = por %p2038_p1, %p62_p0  ;;  %p1550_p5 = scmp.ge.s32.totalorder %s1972_s20, 1 }
   0xd   : > { %p2053_p6 = por %p174_p3, %p62_p0  ;;  %p181_p7 = scmp.lt.s32.totalorder %s1972_s20, 3 }
   0xe   : > { %s2619_s1 = sld [smem:[#allocation13_spill]]  ;;  %s1974_s5 = smov [#allocation6]  }
   0xf   : > { %p2061_p8 = pnand %p1550_p5, %p181_p7  ;;  %s198_s6 = sshll.u32 %s1974_s5, 4  ;;  %s199_s6 = int_to_ptr.vmem [resolvable:$true] %s198_s6 }
  0x10   : > { %p1554_p11 = scmp.ge.s32.totalorder %s1972_s20, 2  ;;  %s2611_s7 = smov 128  }
  0x11   : > { %p1625_p9 = pneg %p2061_p8  ;;  %s2612_s8 = smov 8  }
  0x12   : > { %s40_s9 = sadd.s32 1, %s1968_s19  ;;  %s49_s10 = sadd.s32 1, %s1960_s17 }
  0x13   : > { %p1626_p10 = pnand %p1625_p9, %p2038_p1  ;;  %p42_p12 = scmp.ge.s32.totalorder %s40_s9, 2 }
  0x14   : > { %s196_s29 = sshll.u32 %s2619_s1, 4  ;;  %p56_p13 = scmp.ne.s32.totalorder %s1960_s17, %s1956_s16  ;;  %s197_s29 = int_to_ptr.hbm [resolvable:$true] %s196_s29 }
  0x15   : > { %1628 = dma.hbm_to_vmem [thread:$0]  (!%p1626_p10), %s197_s29, 2048, %s199_s6, [#allocation7], %s2611_s7, %s2611_s7, %s2612_s8  }
  0x16   : > { %p57_p0 = scmp.eq.s32.totalorder %s1972_s20, 0  ;;  %s2633_s9 = smov (%p42_p12, %s40_s9), 0 }
  0x17   : > { %2621 = sst [smem:[#allocation12_spill]] %s2633_s9  ;;  %p2086_p5 = por %p2042_p2, %p56_p13 }
  0x18   : > { %p2080_p3 = por %p57_p0, %p56_p13  ;;  %s44_s13 = ssub.s32 %s1968_s19, %s2633_s9 }
  0x19   : > { %p1638_p7 = scmp.lt.s32.totalorder %s1972_s20, 2  ;;  %p47_p9 = scmp.eq.s32.totalorder %s44_s13, 0 }
  0x1a   : > { %s224_s14 = sand.u32 1, %s1960_s17   ;;  %s1567_s27 = sshll.u32 %s1968_s19, 8 }
  0x1b   : > { %s1555_s21 = sshll.u32 %s224_s14, 8  ;;  %s234_s5 = scalar_lea.hbm %s2606_s0, %s1567_s27 }
  0x1c   : > { %s2095_s22 = scalar_select %p47_p9, %s1960_s17, %s49_s10  }
  0x1d   : > { %s228_s6 = scalar_lea.vmem [#allocation3], %s1555_s21  ;;  %s235_s24 = sshll.u32 %s234_s5, 4  ;;  %s236_s24 = int_to_ptr.hbm [resolvable:$true] %s235_s24 }
  0x1e   : > { %s237_s7 = sshll.u32 %s228_s6, 4  ;;  %p1630_p2 = pnand %p1638_p7, %p2080_p3  ;;  %s238_s7 = int_to_ptr.vmem [resolvable:$true] %s237_s7 }
  0x1f   : > { %s225_s8 = scalar_lea.sflag [#allocation4], %s224_s14  ;;  %s2624_s1 = smov 8  }
  0x20   : > { %s2625_s9 = smov 128   ;;  %249 = sbr.rel (%p2061_p8) target bundleno = 409 (0x199), region = 36 }
  0x21   : > { %1632 = dma.hbm_to_vmem [thread:$0]  (!%p1630_p2), %s236_s24, 4096, %s238_s7, %s225_s8, %s2625_s9, %s2625_s9, %s2624_s1  }
  0x22   : > { %s2109_s10 = sand.u32 (!%p2061_p8), 1, %s1956_s16  }
  0x23   : > { %s1559_s13 = sshll.u32 (!%p2061_p8), %s2109_s10, 8  ;;  %s252_s21 = scalar_lea.sflag (!%p2061_p8), [#allocation4], %s2109_s10 }
  0x24   : > { %s2115_s11 = scalar_lea.vmem (!%p2061_p8), [#allocation3], %s1559_s13 }
  0x25   : > { %1939 = dma.done.wait (%p2048_p4), %s252_s21, 4096  }
  0x26   : > { %1941 = vsyncadd (%p2048_p4), %s252_s21, 4294963200 }
  0x27   : > { %1943 = dma.done.wait (%p2038_p1), [#allocation7], 2048  }
  0x28   : > { %1945 = vsyncadd (%p2038_p1), [#allocation7], 4294965248  ;;  %v416_v0 = vld [vmem:[#allocation6 + $0x78] sm:$0xff]  ;;  %v415_v1 = vld [vmem:[#allocation6 + $0x70] sm:$0xff]  ;;  %s2239_s7 = scalar_lea.vmem [#allocation8], %s1559_s13  ;;  %s1568_s28 = sshll.u32 %s1964_s18, 8 }
  0x29   : > { %417 = vmatpush.msra.mxu0 %v416_v0  ;;  %1569 = vmatpush.msra.mxu1 %v416_v0  ;;  %v414_v2 = vld [vmem:[#allocation6 + $0x68] sm:$0xff]  ;;  %v413_v3 = vld [vmem:[#allocation6 + $0x60] sm:$0xff]  ;;  %v412_v4 = vld [vmem:[#allocation6 + $0x58] sm:$0xff]  ;;  %s1418_s6 = scalar_lea.hbm %s2610_s4, %s1568_s28  ;;  %s1419_s18 = sshll.u32 %s2239_s7, 4  ;;  %s1420_s18 = int_to_ptr.vmem [resolvable:$true] %s1419_s18 }
  0x2a   : > { %1570 = vmatpush.msra.mxu2 %v416_v0  ;;  %1571 = vmatpush.msra.mxu3 %v416_v0  ;;  %v411_v5 = vld [vmem:[#allocation6 + $0x50] sm:$0xff]  ;;  %v410_v6 = vld [vmem:[#allocation6 + $0x48] sm:$0xff]  ;;  %v409_v7 = vld [vmem:[#allocation6 + $0x40] sm:$0xff]  ;;  %s1421_s24 = sshll.u32 %s1418_s6, 4  ;;  %s1406_s13 = scalar_lea.sflag [#allocation5], %s2109_s10  ;;  %s1422_s24 = int_to_ptr.hbm [resolvable:$true] %s1421_s24 }
  0x2b   : > { %418 = vmatpush.msra.mxu0 %v415_v1  ;;  %1572 = vmatpush.msra.mxu1 %v415_v1  ;;  %v408_v8 = vld [vmem:[#allocation6 + $0x38] sm:$0xff]  ;;  %v407_v9 = vld [vmem:[#allocation6 + $0x30] sm:$0xff]  ;;  %v406_v10 = vld [vmem:[#allocation6 + $0x28] sm:$0xff]  ;;  %s1900_s21 = sshra.s32 %s1422_s24, 4  ;;  %s1906_s25 = scalar_lea.hbm %s2610_s4, 512  ;;  %s1901_s21 = int_to_ptr.hbm [resolvable:$true] %s1900_s21 }
  0x2c   : > { %1573 = vmatpush.msra.mxu2 %v415_v1  ;;  %1574 = vmatpush.msra.mxu3 %v415_v1  ;;  %v405_v11 = vld [vmem:[#allocation6 + $0x20] sm:$0xff]  ;;  %v404_v12 = vld [vmem:[#allocation6 + $0x18] sm:$0xff]  ;;  %v403_v13 = vld [vmem:[#allocation6 + $0x10] sm:$0xff]  ;;  %p1907_p10 = scmp.lt.s32.totalorder %s1901_s21, %s2610_s4 }
  0x2d   : > { %419 = vmatpush.msra.mxu0 %v414_v2  ;;  %1575 = vmatpush.msra.mxu1 %v414_v2  ;;  %v402_v14 = vld [vmem:[#allocation6 + $0x8] sm:$0xff]  ;;  %v401_v15 = vld [vmem:[#allocation6] sm:$0xff]  ;;  %v371_v24 = vld [vmem:[%s2115_s11 + $0x10] sm:$0xff] }
  0x2e   : > { %1576 = vmatpush.msra.mxu2 %v414_v2  ;;  %1577 = vmatpush.msra.mxu3 %v414_v2  ;;  %v369_v16 = vld [vmem:[%s2115_s11] sm:$0xff]  ;;  %v370_v20 = vld [vmem:[%s2115_s11 + $0x8] sm:$0xff]  ;;  %v379_v25 = vld [vmem:[%s2115_s11 + $0x50] sm:$0xff] }
  0x2f   : > { %420 = vmatpush.msra.mxu0 %v413_v3  ;;  %1578 = vmatpush.msra.mxu1 %v413_v3  ;;  %v377_v17 = vld [vmem:[%s2115_s11 + $0x40] sm:$0xff]  ;;  %v378_v21 = vld [vmem:[%s2115_s11 + $0x48] sm:$0xff]  ;;  %v387_v26 = vld [vmem:[%s2115_s11 + $0x90] sm:$0xff] }
  0x30   : > { %1579 = vmatpush.msra.mxu2 %v413_v3  ;;  %1580 = vmatpush.msra.mxu3 %v413_v3  ;;  %v385_v18 = vld [vmem:[%s2115_s11 + $0x80] sm:$0xff]  ;;  %v386_v22 = vld [vmem:[%s2115_s11 + $0x88] sm:$0xff]  ;;  %v395_v27 = vld [vmem:[%s2115_s11 + $0xd0] sm:$0xff] }
  0x31   : > { %421 = vmatpush.msra.mxu0 %v412_v4  ;;  %1581 = vmatpush.msra.mxu1 %v412_v4  ;;  %v393_v19 = vld [vmem:[%s2115_s11 + $0xc0] sm:$0xff]  ;;  %v394_v23 = vld [vmem:[%s2115_s11 + $0xc8] sm:$0xff]  ;;  %v372_v28 = vld [vmem:[%s2115_s11 + $0x18] sm:$0xff] }
  0x32   : > { %1582 = vmatpush.msra.mxu2 %v412_v4  ;;  %1583 = vmatpush.msra.mxu3 %v412_v4  ;;  %v380_v29 = vld [vmem:[%s2115_s11 + $0x58] sm:$0xff]  ;;  %v373_v32 = vld [vmem:[%s2115_s11 + $0x20] sm:$0xff]  ;;  %v374_v36 = vld [vmem:[%s2115_s11 + $0x28] sm:$0xff] }
  0x33   : > { %422 = vmatpush.msra.mxu0 %v411_v5  ;;  %1584 = vmatpush.msra.mxu1 %v411_v5  ;;  %v388_v30 = vld [vmem:[%s2115_s11 + $0x98] sm:$0xff]  ;;  %v381_v33 = vld [vmem:[%s2115_s11 + $0x60] sm:$0xff]  ;;  %v382_v37 = vld [vmem:[%s2115_s11 + $0x68] sm:$0xff] }
  0x34   : > { %1585 = vmatpush.msra.mxu2 %v411_v5  ;;  %1586 = vmatpush.msra.mxu3 %v411_v5  ;;  %v396_v31 = vld [vmem:[%s2115_s11 + $0xd8] sm:$0xff]  ;;  %v389_v34 = vld [vmem:[%s2115_s11 + $0xa0] sm:$0xff]  ;;  %v390_v38 = vld [vmem:[%s2115_s11 + $0xa8] sm:$0xff] }
  0x35   : > { %423 = vmatpush.msra.mxu0 %v410_v6  ;;  %1587 = vmatpush.msra.mxu1 %v410_v6  ;;  %v397_v35 = vld [vmem:[%s2115_s11 + $0xe0] sm:$0xff]  ;;  %v398_v39 = vld [vmem:[%s2115_s11 + $0xe8] sm:$0xff]  ;;  %v375_v40 = vld [vmem:[%s2115_s11 + $0x30] sm:$0xff] }
  0x36   : > { %1588 = vmatpush.msra.mxu2 %v410_v6  ;;  %1589 = vmatpush.msra.mxu3 %v410_v6  ;;  %v383_v41 = vld [vmem:[%s2115_s11 + $0x70] sm:$0xff]  ;;  %v376_v44 = vld [vmem:[%s2115_s11 + $0x38] sm:$0xff]  ;;  %v2160_v48 = vld [vmem:[%s2608_s2] ss:$0 sm:$0xff] }
  0x37   : > { %424 = vmatpush.msra.mxu0 %v409_v7  ;;  %1590 = vmatpush.msra.mxu1 %v409_v7  ;;  %v391_v42 = vld [vmem:[%s2115_s11 + $0xb0] sm:$0xff]  ;;  %v384_v45 = vld [vmem:[%s2115_s11 + $0x78] sm:$0xff]  ;;  %v2165_v49 = vld [vmem:[%s2609_s3] ss:$0 sm:$0xff] }
  0x38   : > { %1591 = vmatpush.msra.mxu2 %v409_v7  ;;  %1592 = vmatpush.msra.mxu3 %v409_v7  ;;  %v399_v43 = vld [vmem:[%s2115_s11 + $0xf0] sm:$0xff]  ;;  %v392_v46 = vld [vmem:[%s2115_s11 + $0xb8] sm:$0xff] }
  0x39   : > { %425 = vmatpush.msra.mxu0 %v408_v8  ;;  %1593 = vmatpush.msra.mxu1 %v408_v8  ;;  %v400_v47 = vld [vmem:[%s2115_s11 + $0xf8] sm:$0xff]  ;;  %s1902_s11 = scalar_lea.hbm %s1901_s21, 256 }
  0x3a   : > { %1594 = vmatpush.msra.mxu2 %v408_v8  ;;  %1595 = vmatpush.msra.mxu3 %v408_v8  ;;  %p1903_p1 = scmp.ne.s32.totalorder %s1901_s21, %s1902_s11  ;;  %p1908_p12 = scmp.lt.s32.totalorder %s1906_s25, %s1902_s11 }
  0x3b   : > { %426 = vmatpush.msra.mxu0 %v407_v9  ;;  %1596 = vmatpush.msra.mxu1 %v407_v9 }
  0x3c   : > { %1597 = vmatpush.msra.mxu2 %v407_v9  ;;  %1598 = vmatpush.msra.mxu3 %v407_v9  ;;  %p1904_p4 = pnand %p1903_p1, %p2086_p5  ;;  %p1909_p13 = por %p1908_p12, %p1907_p10 }
  0x3d   : > { %427 = vmatpush.msra.mxu0 %v406_v10  ;;  %1599 = vmatpush.msra.mxu1 %v406_v10 }
  0x3e   : > { %1600 = vmatpush.msra.mxu2 %v406_v10  ;;  %1601 = vmatpush.msra.mxu3 %v406_v10  ;;  %p1905_p8 = pneg %p1904_p4 }
  0x3f   : > { %428 = vmatpush.msra.mxu0 %v405_v11  ;;  %1602 = vmatpush.msra.mxu1 %v405_v11 }
  0x40   : > { %1603 = vmatpush.msra.mxu2 %v405_v11  ;;  %1604 = vmatpush.msra.mxu3 %v405_v11  ;;  %p1910_p0 = pnand %p1909_p13, %p1905_p8 }
  0x41   : > { %429 = vmatpush.msra.mxu0 %v404_v12  ;;  %1605 = vmatpush.msra.mxu1 %v404_v12 }
  0x42   : > { %1606 = vmatpush.msra.mxu2 %v404_v12  ;;  %1607 = vmatpush.msra.mxu3 %v404_v12 }
  0x43   : > { %430 = vmatpush.msra.mxu0 %v403_v13  ;;  %1608 = vmatpush.msra.mxu1 %v403_v13 }
  0x44   : > { %1609 = vmatpush.msra.mxu2 %v403_v13  ;;  %1610 = vmatpush.msra.mxu3 %v403_v13 }
  0x45   : > { %431 = vmatpush.msra.mxu0 %v402_v14  ;;  %1611 = vmatpush.msra.mxu1 %v402_v14 }
  0x46   : > { %1612 = vmatpush.msra.mxu2 %v402_v14  ;;  %1613 = vmatpush.msra.mxu3 %v402_v14 }
  0x47   : > { %432 = vmatpush.msra.mxu0 %v401_v15  ;;  %1614 = vmatpush.msra.mxu1 %v401_v15 }
  0x48   : > { %1615 = vmatpush.msra.mxu2 %v401_v15  ;;  %1616 = vmatpush.msra.mxu3 %v401_v15 }
  0x49   : > { %433 = vmatmul.f32.vlgmr.msra.gmra.mxu0 %v369_v16  ;;  %457 = vmatmul.f32.vlgmr.msra.gmra.mxu1 %v377_v17 }
  0x4a   : > { %481 = vmatmul.f32.vlgmr.msra.gmra.mxu2 %v385_v18  ;;  %505 = vmatmul.f32.vlgmr.msra.gmra.mxu3 %v393_v19 }
  0x51   : > { %436 = vmatmul.f32.gmra.mxu0 %v370_v20  ;;  %460 = vmatmul.f32.gmra.mxu1 %v378_v21 }
  0x52   : > { %484 = vmatmul.f32.gmra.mxu2 %v386_v22  ;;  %508 = vmatmul.f32.gmra.mxu3 %v394_v23 }
  0x59   : > { %439 = vmatmul.f32.gmra.mxu0 %v371_v24  ;;  %463 = vmatmul.f32.gmra.mxu1 %v379_v25 }
  0x5a   : > { %487 = vmatmul.f32.gmra.mxu2 %v387_v26  ;;  %511 = vmatmul.f32.gmra.mxu3 %v395_v27 }
  0x61   : > { %442 = vmatmul.f32.gmra.mxu0 %v372_v28  ;;  %466 = vmatmul.f32.gmra.mxu1 %v380_v29 }
  0x62   : > { %490 = vmatmul.f32.gmra.mxu2 %v388_v30  ;;  %514 = vmatmul.f32.gmra.mxu3 %v396_v31 }
  0x69   : > { %445 = vmatmul.f32.gmra.mxu0 %v373_v32  ;;  %469 = vmatmul.f32.gmra.mxu1 %v381_v33 }
  0x6a   : > { %493 = vmatmul.f32.gmra.mxu2 %v389_v34  ;;  %517 = vmatmul.f32.gmra.mxu3 %v397_v35 }
  0x71   : > { %448 = vmatmul.f32.gmra.mxu0 %v374_v36  ;;  %472 = vmatmul.f32.gmra.mxu1 %v382_v37 }
  0x72   : > { %496 = vmatmul.f32.gmra.mxu2 %v390_v38  ;;  %520 = vmatmul.f32.gmra.mxu3 %v398_v39 }
  0x79   : > { %451 = vmatmul.f32.gmra.mxu0 %v375_v40  ;;  %475 = vmatmul.f32.gmra.mxu1 %v383_v41 }
  0x7a   : > { %499 = vmatmul.f32.gmra.mxu2 %v391_v42  ;;  %523 = vmatmul.f32.gmra.mxu3 %v399_v43 }
  0x81   : > { %454 = vmatmul.f32.gmra.mxu0 %v376_v44  ;;  %478 = vmatmul.f32.gmra.mxu1 %v384_v45 }
  0x82   : > { %502 = vmatmul.f32.gmra.mxu2 %v392_v46  ;;  %526 = vmatmul.f32.gmra.mxu3 %v400_v47 }
  0xc6   : > { %v434_v50 = vpop.f32.mrf.mxu0  ;;  %v458_v51 = vpop.f32.mrf.mxu1 }
  0xc7   : > { %v633_v52 = vmul.f32 %v2160_v48, %v434_v50  ;;  %v641_v53 = vmul.f32 %v2160_v48, %v458_v51 }
  0xc9   : > { %v2170_v54 = vadd.f32 %v2165_v49, %v633_v52  ;;  %v2173_v55 = vadd.f32 %v2165_v49, %v641_v53 }
  0xcb   : > { %v701_v56 = vand.u32 2147483647, %v2170_v54  ;;  %v709_v57 = vand.u32 2147483647, %v2173_v55  ;;  %vm829_vm0 = vcmp.ge.f32.partialorder %v2170_v54, 0.0  ;;  %vm837_vm1 = vcmp.ge.f32.partialorder %v2173_v55, 0.0 }
  0xcd   : > { %v733_v58 = vsub.f32 0.0, %v701_v56  ;;  %v741_v59 = vsub.f32 0.0, %v709_v57  ;;  %v482_v60 = vpop.f32.mrf.mxu2  ;;  %v506_v61 = vpop.f32.mrf.mxu3 }
  0xce   : > { %v649_v62 = vmul.f32 %v2160_v48, %v482_v60  ;;  %v657_v63 = vmul.f32 %v2160_v48, %v506_v61  ;;  %v437_v0 = vpop.f32.mrf.mxu0  ;;  %v461_v1 = vpop.f32.mrf.mxu1 }
  0xcf   : > { %v765_v2 = vmul.f32 1.442695, %v733_v58  ;;  %v781_v3 = vmul.f32 1.442695, %v741_v59  ;;  %v634_v4 = vmul.f32 %v2160_v48, %v437_v0  ;;  %v642_v5 = vmul.f32 %v2160_v48, %v461_v1 }
  0xd0   : > { %v2182_v6 = vadd.f32 %v2165_v49, %v649_v62  ;;  %v2185_v7 = vadd.f32 %v2165_v49, %v657_v63 }
  0xd1   : > { %1696 = vpow2.f32 %v765_v2  ;;  %v2188_v8 = vadd.f32 %v2165_v49, %v634_v4  ;;  %v2191_v9 = vadd.f32 %v2165_v49, %v642_v5 }
  0xd2   : > { %1698 = vpow2.f32 %v781_v3  ;;  %v717_v10 = vand.u32 2147483647, %v2182_v6  ;;  %v725_v11 = vand.u32 2147483647, %v2185_v7  ;;  %vm845_vm2 = vcmp.ge.f32.partialorder %v2182_v6, 0.0 }
  0xd3   : > { %v702_v12 = vand.u32 2147483647, %v2188_v8  ;;  %v710_v13 = vand.u32 2147483647, %v2191_v9  ;;  %vm853_vm3 = vcmp.ge.f32.partialorder %v2185_v7, 0.0  ;;  %vm830_vm4 = vcmp.ge.f32.partialorder %v2188_v8, 0.0 }
  0xd4   : > { %v749_v14 = vsub.f32 0.0, %v717_v10  ;;  %v757_v15 = vsub.f32 0.0, %v725_v11  ;;  %vm838_vm5 = vcmp.ge.f32.partialorder %v2191_v9, 0.0 }
  0xd5   : > { %v734_v16 = vsub.f32 0.0, %v702_v12  ;;  %v742_v17 = vsub.f32 0.0, %v710_v13  ;;  %v485_v18 = vpop.f32.mrf.mxu2  ;;  %v509_v35 = vpop.f32.mrf.mxu3 }
  0xd6   : > { %v797_v19 = vmul.f32 1.442695, %v749_v14  ;;  %v813_v20 = vmul.f32 1.442695, %v757_v15  ;;  %v650_v24 = vmul.f32 %v2160_v48, %v485_v18  ;;  %v2202_v42 = vmul.f32 %v2160_v48, %v509_v35  ;;  %v440_v50 = vpop.f32.mrf.mxu0  ;;  %v464_v51 = vpop.f32.mrf.mxu1 }
  0xd7   : > { %v1697_v21 = vpop.eup %1696  ;;  %v767_v22 = vmul.f32 1.442695, %v734_v16  ;;  %v783_v23 = vmul.f32 1.442695, %v742_v17  ;;  %v635_v0 = vmul.f32 %v2160_v48, %v440_v50  ;;  %v2212_v1 = vmul.f32 %v2160_v48, %v464_v51 }
  0xd8   : > { %v1699_v25 = vpop.eup %1698  ;;  %v861_v26 = vmul.f32 2.0, %v1697_v21  ;;  %v925_v27 = vadd.f32 2.0, %v1697_v21  ;;  %v1021_v28 = vadd.f32 1.0, %v1697_v21  ;;  %1700 = vpow2.f32 %v797_v19 }
  0xd9   : > { %v869_v29 = vmul.f32 2.0, %v1699_v25  ;;  %v933_v30 = vadd.f32 2.0, %v1699_v25  ;;  %v1029_v31 = vadd.f32 1.0, %v1699_v25  ;;  %1702 = vpow2.f32 %v813_v20 }
  0xda   : > { %v893_v32 = vadd.f32 1.0, %v861_v26  ;;  %v957_v33 = vmul.f32 %v1697_v21, %v925_v27  ;;  %v1053_v34 = vmul.f32 %v1021_v28, %v861_v26  ;;  %1704 = vpow2.f32 %v767_v22 }
  0xdb   : > { %v965_v36 = vmul.f32 %v1699_v25, %v933_v30  ;;  %v1061_v37 = vmul.f32 %v1029_v31, %v869_v29  ;;  %1706 = vpow2.f32 %v783_v23  ;;  %v901_v46 = vadd.f32 1.0, %v869_v29 }
  0xdc   : > { %v1085_v38 = vadd.f32 1.0, %v1053_v34  ;;  %v1117_v39 = vadd.f32 2.0, %v957_v33  ;;  %v989_v44 = vsel %vm829_vm0, %v893_v32, %v957_v33  ;;  %v2206_v47 = vadd.f32 %v2165_v49, %v650_v24 }
  0xdd   : > { %v1093_v40 = vadd.f32 1.0, %v1061_v37  ;;  %v1125_v41 = vadd.f32 2.0, %v965_v36  ;;  %v1309_v11 = vmul.f32 %v989_v44, %v2170_v54  ;;  %v997_v12 = vsel %vm837_vm1, %v901_v46, %v965_v36 }
  0xde   : > { %v1701_v43 = vpop.eup %1700  ;;  %v1149_v45 = vsel %vm829_vm0, %v1085_v38, %v1117_v39  ;;  %v718_v18 = vand.u32 2147483647, %v2206_v47  ;;  %v1317_v35 = vmul.f32 %v997_v12, %v2173_v55  ;;  %v2232_v46 = vadd.f32 %v2165_v49, %v2202_v42 }
  0xdf   : > { %v1703_v52 = vpop.eup %1702  ;;  %1708 = vrcp.f32 %v1149_v45  ;;  %v1157_v53 = vsel %vm837_vm1, %v1093_v40, %v1125_v41  ;;  %v877_v56 = vmul.f32 2.0, %v1701_v43  ;;  %v941_v57 = vadd.f32 2.0, %v1701_v43 }
  0xe0   : > { %v1705_v58 = vpop.eup %1704  ;;  %1710 = vrcp.f32 %v1157_v53  ;;  %v1037_v59 = vadd.f32 1.0, %v1701_v43  ;;  %v885_v60 = vmul.f32 2.0, %v1703_v52  ;;  %v949_v61 = vadd.f32 2.0, %v1703_v52 }
  0xe1   : > { %v973_v62 = vmul.f32 %v1701_v43, %v941_v57  ;;  %v1045_v63 = vadd.f32 1.0, %v1703_v52  ;;  %v909_v2 = vadd.f32 1.0, %v877_v56  ;;  %v926_v5 = vadd.f32 2.0, %v1705_v58  ;;  %v1707_v10 = vpop.eup %1706 }
  0xe2   : > { %v1069_v3 = vmul.f32 %v1037_v59, %v877_v56  ;;  %v981_v4 = vmul.f32 %v1703_v52, %v949_v61  ;;  %v862_v17 = vmul.f32 2.0, %v1705_v58  ;;  %v917_v20 = vadd.f32 1.0, %v885_v60 }
  0xe3   : > { %v1133_v13 = vadd.f32 2.0, %v973_v62  ;;  %v1077_v14 = vmul.f32 %v1045_v63, %v885_v60  ;;  %v958_v22 = vmul.f32 %v1705_v58, %v926_v5  ;;  %v1022_v23 = vadd.f32 1.0, %v1705_v58 }
  0xe4   : > { %v1101_v15 = vadd.f32 1.0, %v1069_v3  ;;  %v1141_v16 = vadd.f32 2.0, %v981_v4  ;;  %v1005_v54 = vsel %vm845_vm2, %v909_v2, %v973_v62  ;;  %v934_v27 = vadd.f32 2.0, %v1707_v10  ;;  %v488_v3 = vpop.f32.mrf.mxu2 }
  0xe5   : > { %v1709_v19 = vpop.eup %1708  ;;  %v1109_v21 = vadd.f32 1.0, %v1077_v14  ;;  %v870_v30 = vmul.f32 2.0, %v1707_v10  ;;  %v1054_v32 = vmul.f32 %v1022_v23, %v862_v17  ;;  %v1118_v33 = vadd.f32 2.0, %v958_v22 }
  0xe6   : > { %v1711_v24 = vpop.eup %1710  ;;  %v1213_v25 = vmul.f32 %v1709_v19, %v1149_v45  ;;  %v1165_v26 = vsel %vm845_vm2, %v1101_v15, %v1133_v13  ;;  %v894_v36 = vadd.f32 1.0, %v862_v17  ;;  %v966_v37 = vmul.f32 %v1707_v10, %v934_v27 }
  0xe7   : > { %v1221_v28 = vmul.f32 %v1711_v24, %v1157_v53  ;;  %1712 = vrcp.f32 %v1165_v26  ;;  %v1173_v29 = vsel %vm853_vm3, %v1109_v21, %v1141_v16  ;;  %v1086_v39 = vadd.f32 1.0, %v1054_v32 }
  0xe8   : > { %v1245_v31 = vsub.f32 2.0, %v1213_v25  ;;  %1714 = vrcp.f32 %v1173_v29  ;;  %v1030_v40 = vadd.f32 1.0, %v1707_v10  ;;  %v750_v41 = vsub.f32 0.0, %v718_v18 }
  0xe9   : > { %v1253_v34 = vsub.f32 2.0, %v1221_v28  ;;  %v1325_v44 = vmul.f32 %v1005_v54, %v2182_v6  ;;  %v1013_v45 = vsel %vm853_vm3, %v917_v20, %v981_v4  ;;  %v1150_v55 = vsel %vm830_vm4, %v1086_v39, %v1118_v33 }
  0xea   : > { %v1277_v38 = vmul.f32 %v1709_v19, %v1245_v31  ;;  %v1062_v51 = vmul.f32 %v1030_v40, %v870_v30  ;;  %v1126_v52 = vadd.f32 2.0, %v966_v37  ;;  %1716 = vrcp.f32 %v1150_v55 }
  0xeb   : > { %v1285_v43 = vmul.f32 %v1711_v24, %v1253_v34  ;;  %v799_v57 = vmul.f32 1.442695, %v750_v41  ;;  %v726_v58 = vand.u32 2147483647, %v2232_v46  ;;  %v1333_v59 = vmul.f32 %v1013_v45, %v2185_v7  ;;  %v443_v45 = vpop.f32.mrf.mxu0 }
  0xec   : > { %v1341_v50 = vmul.f32 %v1309_v11, %v1277_v38  ;;  %v1094_v60 = vadd.f32 1.0, %v1062_v51  ;;  %v2244_v61 = vadd.f32 %v2165_v49, %v635_v0  ;;  %v2249_v2 = vadd.f32 %v2165_v49, %v2212_v1  ;;  %v512_v11 = vpop.f32.mrf.mxu3 }
  0xed   : > { %v1713_v53 = vpop.eup %1712  ;;  %v1349_v56 = vmul.f32 %v1317_v35, %v1285_v43  ;;  %1718 = vpow2.f32 %v799_v57  ;;  %v758_v63 = vsub.f32 0.0, %v726_v58  ;;  %v902_v5 = vadd.f32 1.0, %v870_v30 }
  0xee   : > { %v1715_v6 = vpop.eup %1714  ;;  %1373 = vst [vmem:[%s2239_s7] sm:$0xff] %v1341_v50  ;;  %v1229_v42 = vmul.f32 %v1713_v53, %v1165_v26  ;;  %v1158_v10 = vsel %vm838_vm5, %v1094_v60, %v1126_v52  ;;  %v703_v7 = vand.u32 2147483647, %v2244_v61  ;;  %v711_v13 = vand.u32 2147483647, %v2249_v2 }
  0xef   : > { %1381 = vst [vmem:[%s2239_s7 + $0x40] sm:$0xff] %v1349_v56  ;;  %v1237_v62 = vmul.f32 %v1715_v6, %v1173_v29  ;;  %1720 = vrcp.f32 %v1158_v10  ;;  %v815_v0 = vmul.f32 1.442695, %v758_v63  ;;  %v990_v15 = vsel %vm830_vm4, %v894_v36, %v958_v22 }
  0xf0   : > { %v1261_v4 = vsub.f32 2.0, %v1229_v42  ;;  %v735_v1 = vsub.f32 0.0, %v703_v7  ;;  %v651_v16 = vmul.f32 %v2160_v48, %v488_v3  ;;  %v1717_v17 = vpop.eup %1716  ;;  %v743_v19 = vsub.f32 0.0, %v711_v13 }
  0xf1   : > { %v1269_v12 = vsub.f32 2.0, %v1237_v62  ;;  %1722 = vpow2.f32 %v815_v0  ;;  %v659_v20 = vmul.f32 %v2160_v48, %v512_v11  ;;  %v1214_v23 = vmul.f32 %v1717_v17, %v1150_v55 }
  0xf2   : > { %v1293_v14 = vmul.f32 %v1713_v53, %v1261_v4  ;;  %v769_v24 = vmul.f32 1.442695, %v735_v1  ;;  %v2260_v25 = vadd.f32 %v2165_v49, %v651_v16  ;;  %v998_v22 = vsel %vm838_vm5, %v902_v5, %v966_v37 }
  0xf3   : > { %v1301_v18 = vmul.f32 %v1715_v6, %v1269_v12  ;;  %v1719_v54 = vpop.eup %1718  ;;  %v785_v27 = vmul.f32 1.442695, %v743_v19  ;;  %v2265_v28 = vadd.f32 %v2165_v49, %v659_v20  ;;  %v1246_v29 = vsub.f32 2.0, %v1214_v23 }
  0xf4   : > { %v1357_v21 = vmul.f32 %v1325_v44, %v1293_v14  ;;  %v878_v30 = vmul.f32 2.0, %v1719_v54  ;;  %v942_v31 = vadd.f32 2.0, %v1719_v54  ;;  %v1038_v32 = vadd.f32 1.0, %v1719_v54 }
  0xf5   : > { %v1365_v26 = vmul.f32 %v1333_v59, %v1301_v18  ;;  %v1721_v33 = vpop.eup %1720  ;;  %vm846_vm6 = vcmp.ge.f32.partialorder %v2206_v47, 0.0  ;;  %1724 = vpow2.f32 %v769_v24  ;;  %v719_v34 = vand.u32 2147483647, %v2260_v25 }
  0xf6   : > { %1389 = vst [vmem:[%s2239_s7 + $0x80] sm:$0xff] %v1357_v21  ;;  %v727_v35 = vand.u32 2147483647, %v2265_v28  ;;  %v1278_v36 = vmul.f32 %v1717_v17, %v1246_v29  ;;  %v1310_v37 = vmul.f32 %v990_v15, %v2188_v8  ;;  %v1222_v38 = vmul.f32 %v1721_v33, %v1158_v10  ;;  %v467_v29 = vpop.f32.mrf.mxu1 }
  0xf7   : > { %1397 = vst [vmem:[%s2239_s7 + $0xc0] sm:$0xff] %v1365_v26  ;;  %v974_v39 = vmul.f32 %v1719_v54, %v942_v31  ;;  %v1723_v40 = vpop.eup %1722  ;;  %v1318_v41 = vmul.f32 %v998_v22, %v2191_v9  ;;  %v1070_v43 = vmul.f32 %v1038_v32, %v878_v30  ;;  %1726 = vpow2.f32 %v785_v27 }
  0xf8   : > { %v751_v44 = vsub.f32 0.0, %v719_v34  ;;  %v1342_v50 = vmul.f32 %v1310_v37, %v1278_v36  ;;  %v1254_v55 = vsub.f32 2.0, %v1222_v38  ;;  %vm854_vm7 = vcmp.ge.f32.partialorder %v2232_v46, 0.0 }
  0xf9   : > { %v1134_v51 = vadd.f32 2.0, %v974_v39  ;;  %v1102_v52 = vadd.f32 1.0, %v1070_v43  ;;  %v886_v53 = vmul.f32 2.0, %v1723_v40  ;;  %v950_v56 = vadd.f32 2.0, %v1723_v40 }
  0xfa   : > { %v759_v57 = vsub.f32 0.0, %v727_v35  ;;  %1374 = vst [vmem:[%s2239_s7 + $0x8] sm:$0xff] %v1342_v50  ;;  %v1286_v8 = vmul.f32 %v1721_v33, %v1254_v55  ;;  %v1046_v58 = vadd.f32 1.0, %v1723_v40  ;;  %vm831_vm8 = vcmp.ge.f32.partialorder %v2244_v61, 0.0 }
  0xfb   : > { %v636_v9 = vmul.f32 %v2160_v48, %v443_v45  ;;  %v1725_v6 = vpop.eup %1724  ;;  %v910_v42 = vadd.f32 1.0, %v878_v30  ;;  %v1166_v59 = vsel %vm846_vm6, %v1102_v52, %v1134_v51  ;;  %v982_v60 = vmul.f32 %v1723_v40, %v950_v56 }
  0xfc   : > { %v801_v62 = vmul.f32 1.442695, %v751_v44  ;;  %v1350_v63 = vmul.f32 %v1318_v41, %v1286_v8  ;;  %1728 = vrcp.f32 %v1166_v59  ;;  %v1078_v3 = vmul.f32 %v1046_v58, %v886_v53  ;;  %v491_v58 = vpop.f32.mrf.mxu2 }
  0xfd   : > { %v863_v4 = vmul.f32 2.0, %v1725_v6  ;;  %v1727_v5 = vpop.eup %1726  ;;  %v1142_v10 = vadd.f32 2.0, %v982_v60  ;;  %v927_v7 = vadd.f32 2.0, %v1725_v6  ;;  %v1023_v11 = vadd.f32 1.0, %v1725_v6 }
  0xfe   : > { %v817_v12 = vmul.f32 1.442695, %v759_v57  ;;  %1382 = vst [vmem:[%s2239_s7 + $0x48] sm:$0xff] %v1350_v63  ;;  %v918_v0 = vadd.f32 1.0, %v886_v53  ;;  %v1110_v13 = vadd.f32 1.0, %v1078_v3  ;;  %v871_v15 = vmul.f32 2.0, %v1727_v5 }
  0xff   : > { %v895_v14 = vadd.f32 1.0, %v863_v4  ;;  %v959_v1 = vmul.f32 %v1725_v6, %v927_v7  ;;  %v1055_v16 = vmul.f32 %v1023_v11, %v863_v4  ;;  %v935_v17 = vadd.f32 2.0, %v1727_v5 }
 0x100   : > { %v1031_v18 = vadd.f32 1.0, %v1727_v5  ;;  %v1174_v19 = vsel %vm854_vm7, %v1110_v13, %v1142_v10  ;;  %vm839_vm9 = vcmp.ge.f32.partialorder %v2249_v2, 0.0  ;;  %1730 = vpow2.f32 %v801_v62 }
 0x101   : > { %v2285_v20 = vadd.f32 %v2165_v49, %v636_v9  ;;  %v1006_v21 = vsel %vm846_vm6, %v910_v42, %v974_v39  ;;  %1732 = vrcp.f32 %v1174_v19  ;;  %v1087_v23 = vadd.f32 1.0, %v1055_v16 }
 0x102   : > { %v1119_v24 = vadd.f32 2.0, %v959_v1  ;;  %v1729_v54 = vpop.eup %1728  ;;  %v1014_v26 = vsel %vm854_vm7, %v918_v0, %v982_v60  ;;  %v967_v22 = vmul.f32 %v1727_v5, %v935_v17  ;;  %v1063_v27 = vmul.f32 %v1031_v18, %v871_v15 }
 0x103   : > { %1734 = vpow2.f32 %v817_v12  ;;  %v1230_v30 = vmul.f32 %v1729_v54, %v1166_v59  ;;  %v991_v31 = vsel %vm831_vm8, %v895_v14, %v959_v1  ;;  %v704_v33 = vand.u32 2147483647, %v2285_v20  ;;  %v446_v59 = vpop.f32.mrf.mxu0 }
 0x104   : > { %v1151_v32 = vsel %vm831_vm8, %v1087_v23, %v1119_v24  ;;  %v903_v34 = vadd.f32 1.0, %v871_v15  ;;  %v1095_v35 = vadd.f32 1.0, %v1063_v27  ;;  %v1127_v36 = vadd.f32 2.0, %v967_v22 }
 0x105   : > { %1736 = vrcp.f32 %v1151_v32  ;;  %v1262_v37 = vsub.f32 2.0, %v1230_v30  ;;  %vm847_vm10 = vcmp.ge.f32.partialorder %v2260_v25, 0.0  ;;  %v736_v38 = vsub.f32 0.0, %v704_v33  ;;  %v470_v30 = vpop.f32.mrf.mxu1 }
 0x106   : > { %v644_v39 = vmul.f32 %v2160_v48, %v467_v29  ;;  %v1731_v40 = vpop.eup %1730  ;;  %v1326_v41 = vmul.f32 %v1006_v21, %v2206_v47  ;;  %v1334_v43 = vmul.f32 %v1014_v26, %v2232_v46  ;;  %v1311_v44 = vmul.f32 %v991_v31, %v2244_v61  ;;  %v515_v46 = vpop.f32.mrf.mxu3 }
 0x107   : > { %v1159_v45 = vsel %vm839_vm9, %v1095_v35, %v1127_v36  ;;  %v1733_v50 = vpop.eup %1732  ;;  %v1294_v55 = vmul.f32 %v1729_v54, %v1262_v37  ;;  %v879_v51 = vmul.f32 2.0, %v1731_v40  ;;  %v943_v52 = vadd.f32 2.0, %v1731_v40 }
 0x108   : > { %1738 = vrcp.f32 %v1159_v45  ;;  %v1238_v56 = vmul.f32 %v1733_v50, %v1174_v19  ;;  %v999_v57 = vsel %vm839_vm9, %v903_v34, %v967_v22  ;;  %v1039_v8 = vadd.f32 1.0, %v1731_v40 }
 0x109   : > { %v1735_v53 = vpop.eup %1734  ;;  %v771_v47 = vmul.f32 1.442695, %v736_v38  ;;  %v1358_v9 = vmul.f32 %v1326_v41, %v1294_v55  ;;  %v975_v61 = vmul.f32 %v1731_v40, %v943_v52  ;;  %v2306_v42 = vadd.f32 %v2165_v49, %v644_v39 }
 0x10a   : > { %v887_v6 = vmul.f32 2.0, %v1735_v53  ;;  %v1270_v62 = vsub.f32 2.0, %v1238_v56  ;;  %v1071_v63 = vmul.f32 %v1039_v8, %v879_v51  ;;  %v951_v3 = vadd.f32 2.0, %v1735_v53 }
 0x10b   : > { %v1737_v60 = vpop.eup %1736  ;;  %v1047_v4 = vadd.f32 1.0, %v1735_v53  ;;  %1390 = vst [vmem:[%s2239_s7 + $0x88] sm:$0xff] %v1358_v9  ;;  %v1135_v10 = vadd.f32 2.0, %v975_v61  ;;  %v652_v7 = vmul.f32 %v2160_v48, %v491_v58  ;;  %v660_v11 = vmul.f32 %v2160_v48, %v515_v46 }
 0x10c   : > { %v1215_v5 = vmul.f32 %v1737_v60, %v1151_v32  ;;  %v1302_v12 = vmul.f32 %v1733_v50, %v1270_v62  ;;  %v1103_v0 = vadd.f32 1.0, %v1071_v63  ;;  %v983_v13 = vmul.f32 %v1735_v53, %v951_v3 }
 0x10d   : > { %v637_v14 = vmul.f32 %v2160_v48, %v446_v59  ;;  %v1079_v16 = vmul.f32 %v1047_v4, %v887_v6  ;;  %1740 = vpow2.f32 %v771_v47  ;;  %v712_v17 = vand.u32 2147483647, %v2306_v42 }
 0x10e   : > { %v1739_v15 = vpop.eup %1738  ;;  %v1247_v1 = vsub.f32 2.0, %v1215_v5  ;;  %v1366_v18 = vmul.f32 %v1334_v43, %v1302_v12  ;;  %v911_v21 = vadd.f32 1.0, %v879_v51  ;;  %v1167_v23 = vsel %vm847_vm10, %v1103_v0, %v1135_v10 }
 0x10f   : > { %v1223_v19 = vmul.f32 %v1739_v15, %v1159_v45  ;;  %1742 = vrcp.f32 %v1167_v23  ;;  %v1111_v54 = vadd.f32 1.0, %v1079_v16  ;;  %v1143_v26 = vadd.f32 2.0, %v983_v13 }
 0x110   : > { %v1279_v24 = vmul.f32 %v1737_v60, %v1247_v1  ;;  %1398 = vst [vmem:[%s2239_s7 + $0xc8] sm:$0xff] %v1366_v18  ;;  %v1319_v27 = vmul.f32 %v999_v57, %v2249_v2  ;;  %vm855_vm11 = vcmp.ge.f32.partialorder %v2265_v28, 0.0  ;;  %v744_v29 = vsub.f32 0.0, %v712_v17 }
 0x111   : > { %v1255_v22 = vsub.f32 2.0, %v1223_v19  ;;  %v1175_v32 = vsel %vm855_vm11, %v1111_v54, %v1143_v26  ;;  %vm832_vm12 = vcmp.ge.f32.partialorder %v2285_v20, 0.0  ;;  %v2322_v33 = vadd.f32 %v2165_v49, %v652_v7 }
 0x112   : > { %v1343_v31 = vmul.f32 %v1311_v44, %v1279_v24  ;;  %v2325_v34 = vadd.f32 %v2165_v49, %v660_v11  ;;  %v1007_v2 = vsel %vm847_vm10, %v911_v21, %v975_v61  ;;  %1744 = vrcp.f32 %v1175_v32  ;;  %v494_v24 = vpop.f32.mrf.mxu2 }
 0x113   : > { %v1287_v35 = vmul.f32 %v1739_v15, %v1255_v22  ;;  %v787_v36 = vmul.f32 1.442695, %v744_v29  ;;  %v1741_v37 = vpop.eup %1740  ;;  %v720_v38 = vand.u32 2147483647, %v2322_v33  ;;  %v2333_v40 = vadd.f32 %v2165_v49, %v637_v14 }
 0x114   : > { %1375 = vst [vmem:[%s2239_s7 + $0x10] sm:$0xff] %v1343_v31  ;;  %v728_v39 = vand.u32 2147483647, %v2325_v34  ;;  %v645_v41 = vmul.f32 %v2160_v48, %v470_v30  ;;  %v864_v44 = vmul.f32 2.0, %v1741_v37  ;;  %v928_v45 = vadd.f32 2.0, %v1741_v37 }
 0x115   : > { %v1351_v43 = vmul.f32 %v1319_v27, %v1287_v35  ;;  %v1024_v50 = vadd.f32 1.0, %v1741_v37  ;;  %v1743_v55 = vpop.eup %1742  ;;  %v919_v51 = vadd.f32 1.0, %v887_v6  ;;  %1746 = vpow2.f32 %v787_v36 }
 0x116   : > { %v752_v52 = vsub.f32 0.0, %v720_v38  ;;  %v760_v53 = vsub.f32 0.0, %v728_v39  ;;  %v1231_v56 = vmul.f32 %v1743_v55, %v1167_v23  ;;  %v896_v57 = vadd.f32 1.0, %v864_v44  ;;  %v518_v38 = vpop.f32.mrf.mxu3 }
 0x117   : > { %1383 = vst [vmem:[%s2239_s7 + $0x50] sm:$0xff] %v1351_v43  ;;  %v960_v8 = vmul.f32 %v1741_v37, %v928_v45  ;;  %v1056_v47 = vmul.f32 %v1024_v50, %v864_v44  ;;  %v705_v9 = vand.u32 2147483647, %v2333_v40  ;;  %v2339_v61 = vadd.f32 %v2165_v49, %v645_v41  ;;  %v449_v44 = vpop.f32.mrf.mxu0 }
 0x118   : > { %v803_v58 = vmul.f32 1.442695, %v752_v52  ;;  %v819_v46 = vmul.f32 1.442695, %v760_v53  ;;  %v1745_v59 = vpop.eup %1744  ;;  %v1263_v60 = vsub.f32 2.0, %v1231_v56  ;;  %v1327_v62 = vmul.f32 %v1007_v2, %v2260_v25 }
 0x119   : > { %v1088_v6 = vadd.f32 1.0, %v1056_v47  ;;  %v1120_v63 = vadd.f32 2.0, %v960_v8  ;;  %v1015_v3 = vsel %vm855_vm11, %v919_v51, %v983_v13  ;;  %v1239_v4 = vmul.f32 %v1745_v59, %v1175_v32 }
 0x11a   : > { %1748 = vpow2.f32 %v803_v58  ;;  %v737_v5 = vsub.f32 0.0, %v705_v9  ;;  %v1295_v10 = vmul.f32 %v1743_v55, %v1263_v60  ;;  %v992_v7 = vsel %vm832_vm12, %v896_v57, %v960_v8 }
 0x11b   : > { %v1152_v11 = vsel %vm832_vm12, %v1088_v6, %v1120_v63  ;;  %1750 = vpow2.f32 %v819_v46  ;;  %v1747_v12 = vpop.eup %1746  ;;  %v1271_v0 = vsub.f32 2.0, %v1239_v4  ;;  %v713_v14 = vand.u32 2147483647, %v2339_v61 }
 0x11c   : > { %1752 = vrcp.f32 %v1152_v11  ;;  %v773_v25 = vmul.f32 1.442695, %v737_v5  ;;  %v1359_v15 = vmul.f32 %v1327_v62, %v1295_v10  ;;  %v872_v13 = vmul.f32 2.0, %v1747_v12 }
 0x11d   : > { %v936_v1 = vadd.f32 2.0, %v1747_v12  ;;  %v1032_v16 = vadd.f32 1.0, %v1747_v12  ;;  %v1303_v17 = vmul.f32 %v1745_v59, %v1271_v0  ;;  %v1335_v18 = vmul.f32 %v1015_v3, %v2265_v28 }
 0x11e   : > { %1754 = vpow2.f32 %v773_v25  ;;  %v745_v19 = vsub.f32 0.0, %v713_v14  ;;  %1391 = vst [vmem:[%s2239_s7 + $0x90] sm:$0xff] %v1359_v15  ;;  %v1312_v22 = vmul.f32 %v992_v7, %v2285_v20  ;;  %vm840_vm13 = vcmp.ge.f32.partialorder %v2306_v42, 0.0 }
 0x11f   : > { %v968_v21 = vmul.f32 %v1747_v12, %v936_v1  ;;  %v1064_v23 = vmul.f32 %v1032_v16, %v872_v13  ;;  %v1367_v26 = vmul.f32 %v1335_v18, %v1303_v17  ;;  %vm848_vm14 = vcmp.ge.f32.partialorder %v2322_v33, 0.0  ;;  %v473_v17 = vpop.f32.mrf.mxu1 }
 0x120   : > { %v1749_v54 = vpop.eup %1748  ;;  %v904_v29 = vadd.f32 1.0, %v872_v13  ;;  %vm856_vm15 = vcmp.ge.f32.partialorder %v2325_v34, 0.0  ;;  %v789_v36 = vmul.f32 1.442695, %v745_v19  ;;  %v653_v37 = vmul.f32 %v2160_v48, %v494_v24 }
 0x121   : > { %v1751_v27 = vpop.eup %1750  ;;  %v1096_v30 = vadd.f32 1.0, %v1064_v23  ;;  %v1128_v31 = vadd.f32 2.0, %v968_v21  ;;  %v880_v28 = vmul.f32 2.0, %v1749_v54  ;;  %1399 = vst [vmem:[%s2239_s7 + $0xd0] sm:$0xff] %v1367_v26  ;;  %v944_v35 = vadd.f32 2.0, %v1749_v54 }
 0x122   : > { %v1753_v32 = vpop.eup %1752  ;;  %v1040_v2 = vadd.f32 1.0, %v1749_v54  ;;  %v888_v41 = vmul.f32 2.0, %v1751_v27  ;;  %v952_v43 = vadd.f32 2.0, %v1751_v27  ;;  %v1048_v56 = vadd.f32 1.0, %v1751_v27 }
 0x123   : > { %v1216_v20 = vmul.f32 %v1753_v32, %v1152_v11  ;;  %v1160_v39 = vsel %vm840_vm13, %v1096_v30, %v1128_v31  ;;  %v912_v50 = vadd.f32 1.0, %v880_v28  ;;  %v976_v55 = vmul.f32 %v1749_v54, %v944_v35 }
 0x124   : > { %v1755_v45 = vpop.eup %1754  ;;  %1756 = vrcp.f32 %v1160_v39  ;;  %v1072_v51 = vmul.f32 %v1040_v2, %v880_v28  ;;  %v984_v53 = vmul.f32 %v1751_v27, %v952_v43  ;;  %v661_v57 = vmul.f32 %v2160_v48, %v518_v38 }
 0x125   : > { %v1248_v52 = vsub.f32 2.0, %v1216_v20  ;;  %v1136_v47 = vadd.f32 2.0, %v976_v55  ;;  %v929_v58 = vadd.f32 2.0, %v1755_v45  ;;  %v638_v46 = vmul.f32 %v2160_v48, %v449_v44  ;;  %v497_v20 = vpop.f32.mrf.mxu2 }
 0x126   : > { %v1104_v8 = vadd.f32 1.0, %v1072_v51  ;;  %v1000_v59 = vsel %vm840_vm13, %v904_v29, %v968_v21  ;;  %v920_v60 = vadd.f32 1.0, %v888_v41  ;;  %v1080_v62 = vmul.f32 %v1048_v56, %v888_v41 }
 0x127   : > { %v1280_v9 = vmul.f32 %v1753_v32, %v1248_v52  ;;  %v1008_v6 = vsel %vm848_vm14, %v912_v50, %v976_v55  ;;  %v1144_v3 = vadd.f32 2.0, %v984_v53  ;;  %v865_v4 = vmul.f32 2.0, %v1755_v45 }
 0x128   : > { %v1168_v63 = vsel %vm848_vm14, %v1104_v8, %v1136_v47  ;;  %v1112_v10 = vadd.f32 1.0, %v1080_v62  ;;  %v961_v7 = vmul.f32 %v1755_v45, %v929_v58  ;;  %v1025_v12 = vadd.f32 1.0, %v1755_v45 }
 0x129   : > { %v1344_v5 = vmul.f32 %v1312_v22, %v1280_v9  ;;  %1758 = vrcp.f32 %v1168_v63  ;;  %v2368_v0 = vadd.f32 %v2165_v49, %v653_v37  ;;  %v2371_v25 = vadd.f32 %v2165_v49, %v661_v57 }
 0x12a   : > { %v1757_v11 = vpop.eup %1756  ;;  %1760 = vpow2.f32 %v789_v36  ;;  %v1176_v15 = vsel %vm856_vm15, %v1112_v10, %v1144_v3  ;;  %vm833_vm0 = vcmp.ge.f32.partialorder %v2333_v40, 0.0  ;;  %v1057_v13 = vmul.f32 %v1025_v12, %v865_v4 }
 0x12b   : > { %1376 = vst [vmem:[%s2239_s7 + $0x18] sm:$0xff] %v1344_v5  ;;  %v1224_v14 = vmul.f32 %v1757_v11, %v1160_v39  ;;  %1762 = vrcp.f32 %v1176_v15  ;;  %v1121_v1 = vadd.f32 2.0, %v961_v7  ;;  %v721_v16 = vand.u32 2147483647, %v2368_v0 }
 0x12c   : > { %v1320_v19 = vmul.f32 %v1000_v59, %v2306_v42  ;;  %v1328_v21 = vmul.f32 %v1008_v6, %v2322_v33  ;;  %v729_v23 = vand.u32 2147483647, %v2371_v25  ;;  %v1016_v24 = vsel %vm856_vm15, %v920_v60, %v984_v53 }
 0x12d   : > { %v1256_v18 = vsub.f32 2.0, %v1224_v14  ;;  %v1089_v54 = vadd.f32 1.0, %v1057_v13  ;;  %v753_v26 = vsub.f32 0.0, %v721_v16  ;;  %v2384_v22 = vadd.f32 %v2165_v49, %v638_v46 }
 0x12e   : > { %v897_v30 = vadd.f32 1.0, %v865_v4  ;;  %v761_v31 = vsub.f32 0.0, %v729_v23  ;;  %v646_v28 = vmul.f32 %v2160_v48, %v473_v17  ;;  %v654_v56 = vmul.f32 %v2160_v48, %v497_v20  ;;  %v2425_v20 = vld [vmem:[%s2609_s3] ss:$0 sm:$0xff] }
 0x12f   : > { %v1759_v27 = vpop.eup %1758  ;;  %v1288_v29 = vmul.f32 %v1757_v11, %v1256_v18  ;;  %v1153_v33 = vsel %vm833_vm0, %v1089_v54, %v1121_v1  ;;  %v805_v35 = vmul.f32 1.442695, %v753_v26  ;;  %v706_v2 = vand.u32 2147483647, %v2384_v22 }
 0x130   : > { %v1761_v42 = vpop.eup %1760  ;;  %v1232_v32 = vmul.f32 %v1759_v27, %v1168_v63  ;;  %1764 = vrcp.f32 %v1153_v33  ;;  %v821_v44 = vmul.f32 1.442695, %v761_v31  ;;  %v993_v50 = vsel %vm833_vm0, %v897_v30, %v961_v7 }
 0x131   : > { %v1352_v36 = vmul.f32 %v1320_v19, %v1288_v29  ;;  %v873_v37 = vmul.f32 2.0, %v1761_v42  ;;  %v937_v38 = vadd.f32 2.0, %v1761_v42  ;;  %v1763_v39 = vpop.eup %1762  ;;  %v1033_v43 = vadd.f32 1.0, %v1761_v42 }
 0x132   : > { %v1264_v41 = vsub.f32 2.0, %v1232_v32  ;;  %1766 = vpow2.f32 %v805_v35  ;;  %v1240_v45 = vmul.f32 %v1763_v39, %v1176_v15  ;;  %v738_v51 = vsub.f32 0.0, %v706_v2 }
 0x133   : > { %1384 = vst [vmem:[%s2239_s7 + $0x58] sm:$0xff] %v1352_v36  ;;  %v969_v55 = vmul.f32 %v1761_v42, %v937_v38  ;;  %v1065_v53 = vmul.f32 %v1033_v43, %v873_v37  ;;  %1768 = vpow2.f32 %v821_v44  ;;  %vm841_vm1 = vcmp.ge.f32.partialorder %v2339_v61, 0.0 }
 0x134   : > { %v1296_v52 = vmul.f32 %v1759_v27, %v1264_v41  ;;  %v1272_v57 = vsub.f32 2.0, %v1240_v45  ;;  %v775_v47 = vmul.f32 1.442695, %v738_v51  ;;  %v2396_v9 = vadd.f32 %v2165_v49, %v646_v28  ;;  %v452_v51 = vpop.f32.mrf.mxu0 }
 0x135   : > { %v1129_v8 = vadd.f32 2.0, %v969_v55  ;;  %v1097_v46 = vadd.f32 1.0, %v1065_v53  ;;  %v1336_v62 = vmul.f32 %v1016_v24, %v2325_v34  ;;  %v1313_v6 = vmul.f32 %v993_v50, %v2333_v40  ;;  %v521_v34 = vpop.f32.mrf.mxu3 }
 0x136   : > { %v1360_v58 = vmul.f32 %v1328_v21, %v1296_v52  ;;  %v1765_v59 = vpop.eup %1764  ;;  %v1304_v60 = vmul.f32 %v1763_v39, %v1272_v57  ;;  %1770 = vpow2.f32 %v775_v47  ;;  %v714_v4 = vand.u32 2147483647, %v2396_v9  ;;  %v2412_v21 = vld [vmem:[%s2608_s2] ss:$0 sm:$0xff] }
 0x137   : > { %v1217_v48 = vmul.f32 %v1765_v59, %v1153_v33  ;;  %v1161_v3 = vsel %vm841_vm1, %v1097_v46, %v1129_v8  ;;  %v2405_v5 = vadd.f32 %v2165_v49, %v654_v56  ;;  %vm849_vm2 = vcmp.ge.f32.partialorder %v2368_v0, 0.0  ;;  %v476_v56 = vpop.f32.mrf.mxu1 }
 0x138   : > { %v1767_v63 = vpop.eup %1766  ;;  %1392 = vst [vmem:[%s2239_s7 + $0x98] sm:$0xff] %v1360_v58  ;;  %v1368_v10 = vmul.f32 %v1336_v62, %v1304_v60  ;;  %1772 = vrcp.f32 %v1161_v3  ;;  %v746_v15 = vsub.f32 0.0, %v714_v4  ;;  %v905_v13 = vadd.f32 1.0, %v873_v37 }
 0x139   : > { %v881_v7 = vmul.f32 2.0, %v1767_v63  ;;  %v945_v11 = vadd.f32 2.0, %v1767_v63  ;;  %v1769_v12 = vpop.eup %1768  ;;  %v1249_v40 = vsub.f32 2.0, %v1217_v48  ;;  %v1041_v14 = vadd.f32 1.0, %v1767_v63 }
 0x13a   : > { %1400 = vst [vmem:[%s2239_s7 + $0xd8] sm:$0xff] %v1368_v10  ;;  %v889_v16 = vmul.f32 2.0, %v1769_v12  ;;  %v953_v17 = vadd.f32 2.0, %v1769_v12  ;;  %v1049_v49 = vadd.f32 1.0, %v1769_v12  ;;  %v662_v23 = vmul.f32 %v2412_v21, %v521_v34 }
 0x13b   : > { %v977_v1 = vmul.f32 %v1767_v63, %v945_v11  ;;  %v1281_v18 = vmul.f32 %v1765_v59, %v1249_v40  ;;  %v1073_v19 = vmul.f32 %v1041_v14, %v881_v7  ;;  %vm857_vm3 = vcmp.ge.f32.partialorder %v2371_v25, 0.0 }
 0x13c   : > { %v1771_v24 = vpop.eup %1770  ;;  %v985_v26 = vmul.f32 %v1769_v12, %v953_v17  ;;  %v722_v27 = vand.u32 2147483647, %v2405_v5  ;;  %v1081_v31 = vmul.f32 %v1049_v49, %v889_v16  ;;  %v791_v28 = vmul.f32 1.442695, %v746_v15 }
 0x13d   : > { %v1137_v54 = vadd.f32 2.0, %v977_v1  ;;  %v1345_v29 = vmul.f32 %v1313_v6, %v1281_v18  ;;  %v1105_v30 = vadd.f32 1.0, %v1073_v19  ;;  %v1001_v32 = vsel %vm841_vm1, %v905_v13, %v969_v55 }
 0x13e   : > { %v1773_v42 = vpop.eup %1772  ;;  %v1145_v33 = vadd.f32 2.0, %v985_v26  ;;  %v866_v35 = vmul.f32 2.0, %v1771_v24  ;;  %v930_v2 = vadd.f32 2.0, %v1771_v24  ;;  %v1113_v38 = vadd.f32 1.0, %v1081_v31 }
 0x13f   : > { %1377 = vst [vmem:[%s2239_s7 + $0x20] sm:$0xff] %v1345_v29  ;;  %v1225_v36 = vmul.f32 %v1773_v42, %v1161_v3  ;;  %v1169_v37 = vsel %vm849_vm2, %v1105_v30, %v1137_v54  ;;  %v2428_v39 = vadd.f32 %v2425_v20, %v662_v23  ;;  %v913_v41 = vadd.f32 1.0, %v881_v7 }
 0x140   : > { %1774 = vrcp.f32 %v1169_v37  ;;  %v962_v43 = vmul.f32 %v1771_v24, %v930_v2  ;;  %v1026_v44 = vadd.f32 1.0, %v1771_v24  ;;  %v1177_v50 = vsel %vm857_vm3, %v1113_v38, %v1145_v33 }
 0x141   : > { %v1257_v45 = vsub.f32 2.0, %v1225_v36  ;;  %1776 = vpow2.f32 %v791_v28  ;;  %v754_v55 = vsub.f32 0.0, %v722_v27  ;;  %v1321_v8 = vmul.f32 %v1001_v32, %v2339_v61 }
 0x142   : > { %1778 = vrcp.f32 %v1177_v50  ;;  %v1058_v52 = vmul.f32 %v1026_v44, %v866_v35  ;;  %v1122_v53 = vadd.f32 2.0, %v962_v43  ;;  %vm834_vm4 = vcmp.ge.f32.partialorder %v2384_v22, 0.0 }
 0x143   : > { %v1289_v57 = vmul.f32 %v1773_v42, %v1257_v45  ;;  %v807_v47 = vmul.f32 1.442695, %v754_v55  ;;  %v1009_v58 = vsel %vm849_vm2, %v913_v41, %v977_v1  ;;  %v730_v59 = vand.u32 2147483647, %v2428_v39 }
 0x144   : > { %v1090_v46 = vadd.f32 1.0, %v1058_v52  ;;  %v639_v60 = vmul.f32 %v2412_v21, %v452_v51  ;;  %v921_v6 = vadd.f32 1.0, %v889_v16  ;;  %vm842_vm5 = vcmp.ge.f32.partialorder %v2396_v9, 0.0  ;;  %v500_v16 = vpop.f32.mrf.mxu2 }
 0x145   : > { %v1353_v62 = vmul.f32 %v1321_v8, %v1289_v57  ;;  %1780 = vpow2.f32 %v807_v47  ;;  %v647_v63 = vmul.f32 %v2412_v21, %v476_v56  ;;  %v898_v48 = vadd.f32 1.0, %v866_v35  ;;  %v524_v57 = vpop.f32.mrf.mxu3 }
 0x146   : > { %v1775_v61 = vpop.eup %1774  ;;  %v1154_v3 = vsel %vm834_vm4, %v1090_v46, %v1122_v53  ;;  %v762_v4 = vsub.f32 0.0, %v730_v59  ;;  %v2443_v10 = vadd.f32 %v2425_v20, %v639_v60  ;;  %v1329_v34 = vmul.f32 %v1009_v58, %v2368_v0 }
 0x147   : > { %v1777_v7 = vpop.eup %1776  ;;  %1385 = vst [vmem:[%s2239_s7 + $0x60] sm:$0xff] %v1353_v62  ;;  %v1233_v11 = vmul.f32 %v1775_v61, %v1169_v37  ;;  %1782 = vrcp.f32 %v1154_v3  ;;  %v2448_v12 = vadd.f32 %v2425_v20, %v647_v63  ;;  %v1017_v18 = vsel %vm857_vm3, %v921_v6, %v985_v26 }
 0x148   : > { %v1779_v40 = vpop.eup %1778  ;;  %v874_v14 = vmul.f32 2.0, %v1777_v7  ;;  %v938_v15 = vadd.f32 2.0, %v1777_v7  ;;  %v1034_v13 = vadd.f32 1.0, %v1777_v7  ;;  %v823_v1 = vmul.f32 1.442695, %v762_v4 }
 0x149   : > { %v1265_v17 = vsub.f32 2.0, %v1233_v11  ;;  %v1241_v19 = vmul.f32 %v1779_v40, %v1177_v50  ;;  %v707_v49 = vand.u32 2147483647, %v2443_v10  ;;  %v994_v0 = vsel %vm834_vm4, %v898_v48, %v962_v43 }
 0x14a   : > { %v970_v23 = vmul.f32 %v1777_v7, %v938_v15  ;;  %v1066_v24 = vmul.f32 %v1034_v13, %v874_v14  ;;  %1784 = vpow2.f32 %v823_v1  ;;  %v655_v31 = vmul.f32 %v2412_v21, %v500_v16 }
 0x14b   : > { %v1781_v54 = vpop.eup %1780  ;;  %v1297_v27 = vmul.f32 %v1775_v61, %v1265_v17  ;;  %v1273_v29 = vsub.f32 2.0, %v1241_v19  ;;  %v739_v30 = vsub.f32 0.0, %v707_v49  ;;  %v715_v26 = vand.u32 2147483647, %v2448_v12 }
 0x14c   : > { %v1098_v28 = vadd.f32 1.0, %v1066_v24  ;;  %v1130_v42 = vadd.f32 2.0, %v970_v23  ;;  %v882_v32 = vmul.f32 2.0, %v1781_v54  ;;  %v1337_v36 = vmul.f32 %v1017_v18, %v2371_v25 }
 0x14d   : > { %v1783_v33 = vpop.eup %1782  ;;  %v1361_v35 = vmul.f32 %v1329_v34, %v1297_v27  ;;  %v1305_v2 = vmul.f32 %v1779_v40, %v1273_v29  ;;  %v946_v37 = vadd.f32 2.0, %v1781_v54  ;;  %v1314_v41 = vmul.f32 %v994_v0, %v2384_v22  ;;  %v479_v0 = vpop.f32.mrf.mxu1 }
 0x14e   : > { %v1218_v38 = vmul.f32 %v1783_v33, %v1154_v3  ;;  %v1162_v43 = vsel %vm842_vm5, %v1098_v28, %v1130_v42  ;;  %v1042_v44 = vadd.f32 1.0, %v1781_v54  ;;  %v777_v55 = vmul.f32 1.442695, %v739_v30 }
 0x14f   : > { %1393 = vst [vmem:[%s2239_s7 + $0xa0] sm:$0xff] %v1361_v35  ;;  %v1369_v45 = vmul.f32 %v1337_v36, %v1305_v2  ;;  %1786 = vrcp.f32 %v1162_v43  ;;  %v978_v50 = vmul.f32 %v1781_v54, %v946_v37  ;;  %v747_v56 = vsub.f32 0.0, %v715_v26 }
 0x150   : > { %v1785_v51 = vpop.eup %1784  ;;  %v1250_v52 = vsub.f32 2.0, %v1218_v38  ;;  %v1074_v53 = vmul.f32 %v1042_v44, %v882_v32  ;;  %v2463_v25 = vadd.f32 %v2425_v20, %v655_v31  ;;  %v906_v8 = vadd.f32 1.0, %v874_v14  ;;  %v455_v14 = vpop.f32.mrf.mxu0 }
 0x151   : > { %1401 = vst [vmem:[%s2239_s7 + $0xe0] sm:$0xff] %v1369_v45  ;;  %v1138_v22 = vadd.f32 2.0, %v978_v50  ;;  %v890_v47 = vmul.f32 2.0, %v1785_v51  ;;  %v954_v58 = vadd.f32 2.0, %v1785_v51  ;;  %vm850_vm6 = vcmp.ge.f32.partialorder %v2405_v5, 0.0 }
 0x152   : > { %v1282_v46 = vmul.f32 %v1783_v33, %v1250_v52  ;;  %v1106_v59 = vadd.f32 1.0, %v1074_v53  ;;  %v1050_v60 = vadd.f32 1.0, %v1785_v51  ;;  %1788 = vpow2.f32 %v777_v55 }
 0x153   : > { %v986_v62 = vmul.f32 %v1785_v51, %v954_v58  ;;  %v793_v6 = vmul.f32 1.442695, %v747_v56  ;;  %v663_v63 = vmul.f32 %v2412_v21, %v524_v57  ;;  %v723_v4 = vand.u32 2147483647, %v2463_v25 }
 0x154   : > { %v1346_v61 = vmul.f32 %v1314_v41, %v1282_v46  ;;  %v1170_v48 = vsel %vm850_vm6, %v1106_v59, %v1138_v22  ;;  %v1082_v3 = vmul.f32 %v1050_v60, %v890_v47  ;;  %v1002_v11 = vsel %vm842_vm5, %v906_v8, %v970_v23 }
 0x155   : > { %v1787_v7 = vpop.eup %1786  ;;  %v914_v34 = vadd.f32 1.0, %v882_v32  ;;  %1790 = vrcp.f32 %v1170_v48  ;;  %v1146_v40 = vadd.f32 2.0, %v986_v62  ;;  %vm858_vm7 = vcmp.ge.f32.partialorder %v2428_v39, 0.0 }
 0x156   : > { %1378 = vst [vmem:[%s2239_s7 + $0x28] sm:$0xff] %v1346_v61  ;;  %v1226_v15 = vmul.f32 %v1787_v7, %v1162_v43  ;;  %v1114_v13 = vadd.f32 1.0, %v1082_v3  ;;  %1792 = vpow2.f32 %v793_v6  ;;  %v755_v1 = vsub.f32 0.0, %v723_v4 }
 0x157   : > { %v2476_v16 = vadd.f32 %v2425_v20, %v663_v63  ;;  %v1322_v18 = vmul.f32 %v1002_v11, %v2396_v9  ;;  %vm835_vm8 = vcmp.ge.f32.partialorder %v2443_v10, 0.0  ;;  %v640_v49 = vmul.f32 %v2412_v21, %v455_v14 }
 0x158   : > { %v1258_v17 = vsub.f32 2.0, %v1226_v15  ;;  %v1178_v19 = vsel %vm858_vm7, %v1114_v13, %v1146_v40  ;;  %v1789_v23 = vpop.eup %1788  ;;  %v1010_v24 = vsel %vm850_vm6, %v914_v34, %v978_v50  ;;  %v809_v54 = vmul.f32 1.442695, %v755_v1  ;;  %v527_v15 = vpop.f32.mrf.mxu3 }
 0x159   : > { %1794 = vrcp.f32 %v1178_v19  ;;  %v731_v27 = vand.u32 2147483647, %v2476_v16  ;;  %v867_v30 = vmul.f32 2.0, %v1789_v23  ;;  %v931_v31 = vadd.f32 2.0, %v1789_v23 }
 0x15a   : > { %v1290_v29 = vmul.f32 %v1787_v7, %v1258_v17  ;;  %v1027_v9 = vadd.f32 1.0, %v1789_v23  ;;  %v922_v42 = vadd.f32 1.0, %v890_v47  ;;  %1796 = vpow2.f32 %v809_v54  ;;  %v503_v7 = vpop.f32.mrf.mxu2 }
 0x15b   : > { %v1791_v28 = vpop.eup %1790  ;;  %v763_v32 = vsub.f32 0.0, %v731_v27  ;;  %v648_v26 = vmul.f32 %v2412_v21, %v479_v0  ;;  %v963_v36 = vmul.f32 %v1789_v23, %v931_v31  ;;  %v2488_v37 = vadd.f32 %v2425_v20, %v640_v49 }
 0x15c   : > { %v1793_v33 = vpop.eup %1792  ;;  %v1354_v35 = vmul.f32 %v1322_v18, %v1290_v29  ;;  %v1234_v2 = vmul.f32 %v1791_v28, %v1170_v48  ;;  %v1059_v38 = vmul.f32 %v1027_v9, %v867_v30  ;;  %vm843_vm9 = vcmp.ge.f32.partialorder %v2448_v12, 0.0 }
 0x15d   : > { %v875_v41 = vmul.f32 2.0, %v1793_v33  ;;  %v939_v43 = vadd.f32 2.0, %v1793_v33  ;;  %v1035_v44 = vadd.f32 1.0, %v1793_v33  ;;  %v1123_v50 = vadd.f32 2.0, %v963_v36 }
 0x15e   : > { %1386 = vst [vmem:[%s2239_s7 + $0x68] sm:$0xff] %v1354_v35  ;;  %v1266_v45 = vsub.f32 2.0, %v1234_v2  ;;  %v825_v55 = vmul.f32 1.442695, %v763_v32  ;;  %v1330_v52 = vmul.f32 %v1010_v24, %v2405_v5  ;;  %v1018_v53 = vsel %vm858_vm7, %v922_v42, %v986_v62 }
 0x15f   : > { %v1795_v51 = vpop.eup %1794  ;;  %v1091_v56 = vadd.f32 1.0, %v1059_v38  ;;  %v971_v57 = vmul.f32 %v1793_v33, %v939_v43  ;;  %v1067_v47 = vmul.f32 %v1035_v44, %v875_v41  ;;  %vm851_vm10 = vcmp.ge.f32.partialorder %v2463_v25, 0.0 }
 0x160   : > { %v1298_v8 = vmul.f32 %v1791_v28, %v1266_v45  ;;  %v1242_v22 = vmul.f32 %v1795_v51, %v1178_v19  ;;  %1798 = vpow2.f32 %v825_v55  ;;  %v1797_v58 = vpop.eup %1796  ;;  %v708_v60 = vand.u32 2147483647, %v2488_v37 }
 0x161   : > { %v1155_v46 = vsel %vm835_vm8, %v1091_v56, %v1123_v50  ;;  %v1131_v59 = vadd.f32 2.0, %v971_v57  ;;  %v2500_v5 = vadd.f32 %v2425_v20, %v648_v26  ;;  %v1099_v63 = vadd.f32 1.0, %v1067_v47 }
 0x162   : > { %v1362_v62 = vmul.f32 %v1330_v52, %v1298_v8  ;;  %v1274_v6 = vsub.f32 2.0, %v1242_v22  ;;  %1800 = vrcp.f32 %v1155_v46  ;;  %v1338_v61 = vmul.f32 %v1018_v53, %v2428_v39 }
 0x163   : > { %v883_v48 = vmul.f32 2.0, %v1797_v58  ;;  %v947_v3 = vadd.f32 2.0, %v1797_v58  ;;  %v1043_v4 = vadd.f32 1.0, %v1797_v58  ;;  %v899_v34 = vadd.f32 1.0, %v867_v30 }
 0x164   : > { %1394 = vst [vmem:[%s2239_s7 + $0xa8] sm:$0xff] %v1362_v62  ;;  %v1306_v11 = vmul.f32 %v1795_v51, %v1274_v6  ;;  %v1163_v40 = vsel %vm843_vm9, %v1099_v63, %v1131_v59  ;;  %v740_v14 = vsub.f32 0.0, %v708_v60  ;;  %v907_v13 = vadd.f32 1.0, %v875_v41 }
 0x165   : > { %1802 = vrcp.f32 %v1163_v40  ;;  %v979_v1 = vmul.f32 %v1797_v58, %v947_v3  ;;  %v1075_v17 = vmul.f32 %v1043_v4, %v883_v48  ;;  %v716_v49 = vand.u32 2147483647, %v2500_v5 }
 0x166   : > { %v1799_v18 = vpop.eup %1798  ;;  %v1370_v19 = vmul.f32 %v1338_v61, %v1306_v11  ;;  %v779_v39 = vmul.f32 1.442695, %v740_v14  ;;  %v656_v0 = vmul.f32 %v2412_v21, %v503_v7  ;;  %v664_v27 = vmul.f32 %v2412_v21, %v527_v15 }
 0x167   : > { %v1107_v23 = vadd.f32 1.0, %v1075_v17  ;;  %v1139_v24 = vadd.f32 2.0, %v979_v1  ;;  %v891_v54 = vmul.f32 2.0, %v1799_v18  ;;  %v995_v30 = vsel %vm835_vm8, %v899_v34, %v963_v36 }
 0x168   : > { %v1801_v29 = vpop.eup %1800  ;;  %1402 = vst [vmem:[%s2239_s7 + $0xe8] sm:$0xff] %v1370_v19  ;;  %v955_v31 = vadd.f32 2.0, %v1799_v18  ;;  %v1051_v9 = vadd.f32 1.0, %v1799_v18  ;;  %1804 = vpow2.f32 %v779_v39  ;;  %v1003_v42 = vsel %vm843_vm9, %v907_v13, %v971_v57 }
 0x169   : > { %v1219_v28 = vmul.f32 %v1801_v29, %v1155_v46  ;;  %v1171_v32 = vsel %vm851_vm10, %v1107_v23, %v1139_v24  ;;  %v748_v26 = vsub.f32 0.0, %v716_v49  ;;  %v2517_v21 = vadd.f32 %v2425_v20, %v656_v0 }
 0x16a   : > { %1806 = vrcp.f32 %v1171_v32  ;;  %v987_v33 = vmul.f32 %v1799_v18, %v955_v31  ;;  %v1083_v35 = vmul.f32 %v1051_v9, %v891_v54  ;;  %vm859_vm11 = vcmp.ge.f32.partialorder %v2476_v16, 0.0 }
 0x16b   : > { %v1803_v2 = vpop.eup %1802  ;;  %v1251_v38 = vsub.f32 2.0, %v1219_v28  ;;  %v795_v36 = vmul.f32 1.442695, %v748_v26  ;;  %v2521_v41 = vadd.f32 %v2425_v20, %v664_v27  ;;  %v1315_v43 = vmul.f32 %v995_v30, %v2443_v10 }
 0x16c   : > { %v1227_v44 = vmul.f32 %v1803_v2, %v1163_v40  ;;  %v1115_v45 = vadd.f32 1.0, %v1083_v35  ;;  %v1147_v50 = vadd.f32 2.0, %v987_v33  ;;  %v1323_v51 = vmul.f32 %v1003_v42, %v2448_v12 }
 0x16d   : > { %v1283_v55 = vmul.f32 %v1801_v29, %v1251_v38  ;;  %1808 = vpow2.f32 %v795_v36  ;;  %v724_v52 = vand.u32 2147483647, %v2517_v21  ;;  %v915_v57 = vadd.f32 1.0, %v883_v48 }
 0x16e   : > { %v1805_v53 = vpop.eup %1804  ;;  %v1259_v56 = vsub.f32 2.0, %v1227_v44  ;;  %v1179_v8 = vsel %vm859_vm11, %v1115_v45, %v1147_v50  ;;  %v732_v20 = vand.u32 2147483647, %v2521_v41  ;;  %v923_v11 = vadd.f32 1.0, %v891_v54 }
 0x16f   : > { %v1347_v22 = vmul.f32 %v1315_v43, %v1283_v55  ;;  %1810 = vrcp.f32 %v1179_v8  ;;  %v868_v10 = vmul.f32 2.0, %v1805_v53  ;;  %v932_v47 = vadd.f32 2.0, %v1805_v53 }
 0x170   : > { %v1807_v58 = vpop.eup %1806  ;;  %v1291_v46 = vmul.f32 %v1803_v2, %v1259_v56  ;;  %v1028_v12 = vadd.f32 1.0, %v1805_v53  ;;  %v756_v59 = vsub.f32 0.0, %v724_v52  ;;  %v764_v60 = vsub.f32 0.0, %v732_v20 }
 0x171   : > { %1379 = vst [vmem:[%s2239_s7 + $0x30] sm:$0xff] %v1347_v22  ;;  %v1235_v62 = vmul.f32 %v1807_v58, %v1171_v32  ;;  %v964_v6 = vmul.f32 %v1805_v53, %v932_v47  ;;  %v1011_v61 = vsel %vm851_vm10, %v915_v57, %v979_v1  ;;  %vm836_vm12 = vcmp.ge.f32.partialorder %v2488_v37, 0.0 }
 0x172   : > { %v1355_v63 = vmul.f32 %v1323_v51, %v1291_v46  ;;  %v1060_v48 = vmul.f32 %v1028_v12, %v868_v10  ;;  %v811_v3 = vmul.f32 1.442695, %v756_v59  ;;  %v827_v13 = vmul.f32 1.442695, %v764_v60 }
 0x173   : > { %v1809_v4 = vpop.eup %1808  ;;  %v1267_v7 = vsub.f32 2.0, %v1235_v62  ;;  %v1124_v34 = vadd.f32 2.0, %v964_v6  ;;  %v1331_v19 = vmul.f32 %v1011_v61, %v2463_v25  ;;  %v1019_v24 = vsel %vm859_vm11, %v923_v11, %v987_v33 }
 0x174   : > { %1387 = vst [vmem:[%s2239_s7 + $0x70] sm:$0xff] %v1355_v63  ;;  %v1092_v40 = vadd.f32 1.0, %v1060_v48  ;;  %v876_v14 = vmul.f32 2.0, %v1809_v4  ;;  %v940_v15 = vadd.f32 2.0, %v1809_v4  ;;  %v1036_v39 = vadd.f32 1.0, %v1809_v4 }
 0x175   : > { %v1811_v17 = vpop.eup %1810  ;;  %v1299_v18 = vmul.f32 %v1807_v58, %v1267_v7  ;;  %1812 = vpow2.f32 %v811_v3  ;;  %v1339_v31 = vmul.f32 %v1019_v24, %v2476_v16  ;;  %v900_v9 = vadd.f32 1.0, %v868_v10 }
 0x176   : > { %v1243_v1 = vmul.f32 %v1811_v17, %v1179_v8  ;;  %v1156_v49 = vsel %vm836_vm12, %v1092_v40, %v1124_v34  ;;  %v972_v0 = vmul.f32 %v1809_v4, %v940_v15  ;;  %v1068_v54 = vmul.f32 %v1036_v39, %v876_v14 }
 0x177   : > { %v1363_v23 = vmul.f32 %v1331_v19, %v1299_v18  ;;  %1814 = vrcp.f32 %v1156_v49  ;;  %vm844_vm13 = vcmp.ge.f32.partialorder %v2500_v5, 0.0  ;;  %v996_v36 = vsel %vm836_vm12, %v900_v9, %v964_v6 }
 0x178   : > { %v1275_v27 = vsub.f32 2.0, %v1243_v1  ;;  %v1132_v29 = vadd.f32 2.0, %v972_v0  ;;  %1816 = vpow2.f32 %v827_v13  ;;  %v1100_v30 = vadd.f32 1.0, %v1068_v54 }
 0x179   : > { %1395 = vst [vmem:[%s2239_s7 + $0xb0] sm:$0xff] %v1363_v23  ;;  %v908_v52 = vadd.f32 1.0, %v876_v14  ;;  %v1316_v22 = vmul.f32 %v996_v36, %v2488_v37  ;;  %vm852_vm14 = vcmp.ge.f32.partialorder %v2517_v21, 0.0  ;;  %vm860_vm15 = vcmp.ge.f32.partialorder %v2521_v41, 0.0 }
 0x17a   : > { %v1307_v25 = vmul.f32 %v1811_v17, %v1275_v27  ;;  %v1164_v42 = vsel %vm844_vm13, %v1100_v30, %v1132_v29 }
 0x17b   : > { %v1813_v28 = vpop.eup %1812  ;;  %1818 = vrcp.f32 %v1164_v42  ;;  %v1004_v59 = vsel %vm844_vm13, %v908_v52, %v972_v0 }
 0x17c   : > { %v1371_v32 = vmul.f32 %v1339_v31, %v1307_v25  ;;  %v884_v26 = vmul.f32 2.0, %v1813_v28  ;;  %v948_v33 = vadd.f32 2.0, %v1813_v28  ;;  %v1044_v2 = vadd.f32 1.0, %v1813_v28 }
 0x17d   : > { %v1815_v35 = vpop.eup %1814  ;;  %v1324_v63 = vmul.f32 %v1004_v59, %v2500_v5 }
 0x17e   : > { %v1817_v38 = vpop.eup %1816  ;;  %1403 = vst [vmem:[%s2239_s7 + $0xf0] sm:$0xff] %v1371_v32  ;;  %v1220_v43 = vmul.f32 %v1815_v35, %v1156_v49  ;;  %v980_v16 = vmul.f32 %v1813_v28, %v948_v33  ;;  %v1076_v44 = vmul.f32 %v1044_v2, %v884_v26  ;;  %v916_v61 = vadd.f32 1.0, %v884_v26 }
 0x17f   : > { %v892_v45 = vmul.f32 2.0, %v1817_v38  ;;  %v956_v50 = vadd.f32 2.0, %v1817_v38  ;;  %v1052_v55 = vadd.f32 1.0, %v1817_v38 }
 0x180   : > { %v1252_v51 = vsub.f32 2.0, %v1220_v43  ;;  %v1140_v53 = vadd.f32 2.0, %v980_v16  ;;  %v1108_v56 = vadd.f32 1.0, %v1076_v44  ;;  %v1012_v11 = vsel %vm852_vm14, %v916_v61, %v980_v16 }
 0x181   : > { %v988_v57 = vmul.f32 %v1817_v38, %v956_v50  ;;  %v1819_v8 = vpop.eup %1818  ;;  %v1084_v10 = vmul.f32 %v1052_v55, %v892_v45  ;;  %v924_v7 = vadd.f32 1.0, %v892_v45  ;;  %v1332_v15 = vmul.f32 %v1012_v11, %v2517_v21 }
 0x182   : > { %v1284_v20 = vmul.f32 %v1815_v35, %v1252_v51  ;;  %v1228_v47 = vmul.f32 %v1819_v8, %v1164_v42  ;;  %v1172_v58 = vsel %vm852_vm14, %v1108_v56, %v1140_v53 }
 0x183   : > { %v1148_v46 = vadd.f32 2.0, %v988_v57  ;;  %1820 = vrcp.f32 %v1172_v58  ;;  %v1116_v60 = vadd.f32 1.0, %v1084_v10  ;;  %v1020_v13 = vsel %vm860_vm15, %v924_v7, %v988_v57 }
 0x184   : > { %v1348_v12 = vmul.f32 %v1316_v22, %v1284_v20  ;;  %v1260_v62 = vsub.f32 2.0, %v1228_v47  ;;  %v1340_v39 = vmul.f32 %v1020_v13, %v2521_v41 }
 0x185   : > { %v1180_v37 = vsel %vm860_vm15, %v1116_v60, %v1148_v46 }
 0x186   : > { %1380 = vst [vmem:[%s2239_s7 + $0x38] sm:$0xff] %v1348_v12  ;;  %v1292_v6 = vmul.f32 %v1819_v8, %v1260_v62  ;;  %1822 = vrcp.f32 %v1180_v37 }
 0x188   : > { %v1356_v48 = vmul.f32 %v1324_v63, %v1292_v6 }
 0x189   : > { %v1821_v3 = vpop.eup %1820 }
 0x18a   : > { %1388 = vst [vmem:[%s2239_s7 + $0x78] sm:$0xff] %v1356_v48  ;;  %v1236_v4 = vmul.f32 %v1821_v3, %v1172_v58 }
 0x18c   : > { %v1823_v34 = vpop.eup %1822  ;;  %v1268_v40 = vsub.f32 2.0, %v1236_v4 }
 0x18d   : > { %v1244_v14 = vmul.f32 %v1823_v34, %v1180_v37 }
 0x18e   : > { %v1300_v5 = vmul.f32 %v1821_v3, %v1268_v40 }
 0x18f   : > { %v1276_v17 = vsub.f32 2.0, %v1244_v14 }
 0x190   : > { %v1364_v18 = vmul.f32 %v1332_v15, %v1300_v5 }
 0x191   : > { %v1308_v19 = vmul.f32 %v1823_v34, %v1276_v17 }
 0x192   : > { %1396 = vst [vmem:[%s2239_s7 + $0xb8] sm:$0xff] %v1364_v18 }
 0x193   : > { %v1372_v1 = vmul.f32 %v1340_v39, %v1308_v19 }
 0x195   : > { %1404 = vst [vmem:[%s2239_s7 + $0xf8] sm:$0xff] %v1372_v1 }
 0x196   : > { %1913 = shalt.err (!%p1910_p0)
}
 0x197   : > { %s1977_s10 = smov 128   ;;  %s1978_s7 = smov 8  }
 0x198   : > { %1623 = dma.vmem_to_hbm [thread:$0]  (%p2086_p5), %s1420_s18, 4096, %s1422_s24, %s1406_s13, %s1977_s10, %s1977_s10, %s1978_s7  }
 0x199 PF: > { %s1436_s9 = sand.u32 1, %s1952_s15   ;;  %p1634_p3 = pnand %p1554_p11, %p2053_p6 }
 0x19a   : > { %s1437_s14 = scalar_lea.sflag [#allocation5], %s1436_s9 }
 0x19b   : > { %p1635_p7 = pneg %p1634_p3 }
 0x19d   : > { %1947 = dma.done.wait (%p1635_p7), %s1437_s14, 4096  }
 0x19e   : > { %1949 = vsyncadd (%p1635_p7), %s1437_s14, 4294963200  ;;  %s21_s20 = sadd.s32 1, %s1972_s20   ;;  %s2626_s12 = sld [smem:[#allocation12_spill]] }
 0x19f   : > { %p18_p9 = scmp.ge.s32.totalorder %s21_s20, 4   ;;  %s2627_s15 = smov %s1956_s16 }
 0x1a0   : > { %s2628_s16 = smov %s1960_s17  ;;  %s2629_s17 = smov %s2095_s22 }
 0x1a1   : > { %s2630_s18 = smov %s1968_s19  ;;  %20 = sbr.rel (!%p18_p9) target bundleno = 9 (0x9), region = 100 }
 0x1a4   : > { %s2631_s19 = smov %s2626_s12 }
 0x1a6   :  { %1443 = vsyncpa [#allocation4], 1 }
 0x1a7   :  { %1445 = vsyncpa [#allocation4 + $0x1], 1 }
 0x1a8   :  { %1446 = vsyncpa [#allocation7], 1 }
 0x1a9   :  { %1447 = vsyncpa [#allocation5], 1 }
 0x1aa   :  { %1449 = vsyncpa [#allocation5 + $0x1], 1 }

</bundles_post_ra>
